<compile_context>
chip_gen: v7x
topology: tpu7x:2x2x1
jax: 0.10.0
libtpu: 0.0.40
codegen_flags: <defaults>
</compile_context>

<pallas_src>
import functools

import jax
import jax.numpy as jnp
from jax.experimental import pallas as pl
from jax.experimental.pallas import tpu as pltpu


def _conv_tile(xp_ref, w_ref, r, *, KH, KW, th, Wout, Cout):
    """stride==1: conv output of one row tile as a (th*Wout, Cout) f32 slab."""
    h0 = pl.multiple_of(r * th, th)
    acc = jnp.zeros((th * Wout, Cout), jnp.float32)
    for kh in range(KH):
        for kw in range(KW):
            win = xp_ref[pl.ds(h0 + kh, th), pl.ds(kw, Wout), :]  # (th, Wout, Cin)
            acc = acc + jnp.dot(win.reshape(th * Wout, -1),
                                w_ref[kh * KW + kw],
                                preferred_element_type=jnp.float32)
    return acc


def _conv_row(xp_ref, w_ref, ho, *, KH, KW, Wout, Cout, stride):
    """General-stride fallback: conv output of one row, (Wout, Cout) f32."""
    acc = jnp.zeros((Wout, Cout), jnp.float32)
    h0 = ho * stride
    for kh in range(KH):
        for kw in range(KW):
            win = xp_ref[h0 + kh, pl.ds(kw, Wout, stride), :]     # (Wout, Cin)
            acc = acc + jnp.dot(win, w_ref[kh * KW + kw],
                                preferred_element_type=jnp.float32)
    return acc


def _stats_kernel(xp_ref, w_ref, stats_ref, *, KH, KW, th, Wout, Cout, stride):
    """Phase 1: per-image per-channel sum / sum-of-squares of the conv output."""
    r = pl.program_id(1)

    @pl.when(r == 0)
    def _():
        stats_ref[...] = jnp.zeros_like(stats_ref)

    if stride == 1:
        conv = _conv_tile(xp_ref, w_ref, r, KH=KH, KW=KW, th=th,
                          Wout=Wout, Cout=Cout)                    # (th*Wout, Cout)
        s = jnp.sum(conv, axis=0, keepdims=True)
        ss = jnp.sum(conv * conv, axis=0, keepdims=True)
    else:
        def body(i, carry):
            s, ss = carry
            row = _conv_row(xp_ref, w_ref, r * th + i, KH=KH, KW=KW,
                            Wout=Wout, Cout=Cout, stride=stride)
            return (s + jnp.sum(row, axis=0, keepdims=True),
                    ss + jnp.sum(row * row, axis=0, keepdims=True))
        zero = jnp.zeros((1, Cout), jnp.float32)
        s, ss = jax.lax.fori_loop(0, th, body, (zero, zero))

    stats_ref[0:1, :] += s
    stats_ref[1:2, :] += ss


def _norm_kernel(xp_ref, w_ref, scale_ref, bias_ref, out_ref, *,
                 KH, KW, th, Wout, Cout, stride, slope):
    """Phase 2: recompute conv per row tile, apply folded BN FMA + LeakyReLU."""
    r = pl.program_id(1)

    if stride == 1:
        conv = _conv_tile(xp_ref, w_ref, r, KH=KH, KW=KW, th=th,
                          Wout=Wout, Cout=Cout)                    # (th*Wout, Cout)
        y = conv * scale_ref[...] + bias_ref[...]
        y = jnp.where(y > 0, y, slope * y)
        out_ref[...] = y.reshape(th, Wout, Cout)
    else:
        # Broadcast hoisted out of the row loop.
        scale = jnp.broadcast_to(scale_ref[...], (Wout, Cout))
        bias = jnp.broadcast_to(bias_ref[...], (Wout, Cout))

        def body(i, carry):
            row = _conv_row(xp_ref, w_ref, r * th + i, KH=KH, KW=KW,
                            Wout=Wout, Cout=Cout, stride=stride)
            y = row * scale + bias
            out_ref[i] = jnp.where(y > 0, y, slope * y)
            return carry

        jax.lax.fori_loop(0, th, body, 0)


def _pick_row_tile(hout, target):
    """Largest divisor of hout that is <= target (keeps every row tile full)."""
    cap = max(1, min(hout, target))
    for t in range(cap, 0, -1):
        if hout % t == 0:
            return t
    return 1


def conv_block_forward_nhwc(x_nhwc, weight_oihw, gamma, beta, *,
                            stride, padding, eps=1e-5, slope=0.1, row_tile=32):
    """ConvBlock forward on NHWC input (preferred, transpose-free path).

    x_nhwc: (N, H, W, Cin) f32; weight_oihw: (Cout, Cin, KH, KW).
    Returns (N, Hout, Wout, Cout) f32.
    """
    N, H, W, Cin = x_nhwc.shape
    Cout, Cin_w, KH, KW = weight_oihw.shape
    assert Cin_w == Cin
    Hout = (H + 2 * padding - KH) // stride + 1
    Wout = (W + 2 * padding - KW) // stride + 1
    Hp, Wp = H + 2 * padding, W + 2 * padding
    th = _pick_row_tile(Hout, row_tile)
    R = Hout // th

    x = x_nhwc.astype(jnp.float32)
    # Spatial zero-padding (cheap wrapper op; downstream kernels read it straight
    # from HBM blocks -- no im2col materialization).
    if padding > 0:
        x = jnp.pad(x, ((0, 0), (padding, padding), (padding, padding), (0, 0)))

    # Weights (Cout, Cin, KH, KW) -> (KH*KW, Cin, Cout) matmul layout (tiny, one-off).
    w = jnp.transpose(weight_oihw.astype(jnp.float32), (2, 3, 1, 0)).reshape(
        KH * KW, Cin, Cout)

    common = dict(KH=KH, KW=KW, th=th, Wout=Wout, Cout=Cout, stride=stride)

    # ---- phase 1: per-image per-channel sum / sum-of-squares --------------------
    stats = pl.pallas_call(
        functools.partial(_stats_kernel, **common),
        out_shape=jax.ShapeDtypeStruct((N, 2, Cout), jnp.float32),
        grid=(N, R),
        in_specs=[
            # padded image: batch dim squeezed, resident across the row-tile axis
            pl.BlockSpec((None, Hp, Wp, Cin), lambda n, r: (n, 0, 0, 0)),
            pl.BlockSpec((KH * KW, Cin, Cout), lambda n, r: (0, 0, 0)),
        ],
        # per-image accumulator: resident across the (arbitrary) row-tile axis
        out_specs=pl.BlockSpec((None, 2, Cout), lambda n, r: (n, 0, 0)),
        compiler_params=pltpu.CompilerParams(
            dimension_semantics=("parallel", "arbitrary")),
    )(x, w)

    # ---- fold BN (training-mode batch stats, biased var) into one FMA ----------
    count = float(N * Hout * Wout)
    g = gamma.astype(jnp.float32)
    b = beta.astype(jnp.float32)
    sums = jnp.sum(stats, axis=0)                       # (2, Cout)
    mean = sums[0] / count
    var = jnp.maximum(sums[1] / count - mean * mean, 0.0)
    inv_std = jax.lax.rsqrt(var + eps)
    scale = (g * inv_std).reshape(1, Cout)
    bias = (b - mean * g * inv_std).reshape(1, Cout)

    # ---- phase 2: recompute conv per row tile, normalize + LeakyReLU -----------
    y = pl.pallas_call(
        functools.partial(_norm_kernel, **common, slope=slope),
        out_shape=jax.ShapeDtypeStruct((N, Hout, Wout, Cout), jnp.float32),
        grid=(N, R),
        in_specs=[
            pl.BlockSpec((None, Hp, Wp, Cin), lambda n, r: (n, 0, 0, 0)),
            pl.BlockSpec((KH * KW, Cin, Cout), lambda n, r: (0, 0, 0)),
            pl.BlockSpec((1, Cout), lambda n, r: (0, 0)),
            pl.BlockSpec((1, Cout), lambda n, r: (0, 0)),
        ],
        out_specs=pl.BlockSpec((None, th, Wout, Cout), lambda n, r: (n, r, 0, 0)),
        compiler_params=pltpu.CompilerParams(
            # fully independent tiles -> megacore sharding on v7x (2 TCs)
            dimension_semantics=("parallel", "parallel")),
    )(x, w, scale, bias)
    return y


def conv_block_forward(x_nchw, weight_oihw, gamma, beta, *, stride, padding,
                       eps=1e-5, slope=0.1, row_tile=32):
    """NCHW adapter for PyTorch parity (wrapper-side transposes only)."""
    x_nhwc = jnp.transpose(x_nchw, (0, 2, 3, 1))
    y = conv_block_forward_nhwc(x_nhwc, weight_oihw, gamma, beta,
                                stride=stride, padding=padding,
                                eps=eps, slope=slope, row_tile=row_tile)
    return jnp.transpose(y, (0, 3, 1, 2))


def _reference(x_nchw, weight_oihw, gamma, beta, *, stride, padding,
               eps=1e-5, slope=0.1):
    conv = jax.lax.conv_general_dilated(
        x_nchw, weight_oihw, window_strides=(stride, stride),
        padding=[(padding, padding), (padding, padding)],
        dimension_numbers=("NCHW", "OIHW", "NCHW"))
    mean = jnp.mean(conv, axis=(0, 2, 3), keepdims=True)
    var = jnp.mean((conv - mean) ** 2, axis=(0, 2, 3), keepdims=True)
    y = (conv - mean) * jax.lax.rsqrt(var + eps)
    y = y * gamma.reshape(1, -1, 1, 1) + beta.reshape(1, -1, 1, 1)
    return jnp.where(y > 0, y, slope * y)


if __name__ == "__main__":
    # ConvBlock(in_channels=4, out_channels=8, kernel_size=3, stride=1, padding=1)
    N, Cin, H, W = 2, 4, 16, 16
    Cout, KH, KW = 8, 3, 3
    stride, padding = 1, 1

    key = jax.random.PRNGKey(0)
    kx, kw = jax.random.split(key)
    x = jax.random.normal(kx, (N, Cin, H, W), dtype=jnp.float32)
    weight = jax.random.normal(kw, (Cout, Cin, KH, KW), dtype=jnp.float32) * 0.1
    gamma = jnp.ones((Cout,), dtype=jnp.float32)   # BatchNorm2d default affine
    beta = jnp.zeros((Cout,), dtype=jnp.float32)

    fwd = jax.jit(functools.partial(conv_block_forward, stride=stride,
                                    padding=padding, row_tile=8))
    out = jax.block_until_ready(fwd(x, weight, gamma, beta))

    ref = _reference(x, weight, gamma, beta, stride=stride, padding=padding)
    assert out.shape == (N, Cout, H, W)
    assert jnp.allclose(out, ref, rtol=1e-4, atol=1e-4), "mismatch vs reference"

    print("KERNEL_OK")
</pallas_src>

<mosaic_0001>
module attributes {stable_mosaic.version = 11 : i64} {
  func.func @_stats_kernel(%arg0: i32, %arg1: i32, %arg2: memref<1x18x18x4xf32, #tpu.memory_space<vmem>>, %arg3: memref<9x4x8xf32, #tpu.memory_space<vmem>>, %arg4: memref<1x2x8xf32, #tpu.memory_space<vmem>>) attributes {dimension_semantics = [#tpu.dimension_semantics<parallel>, #tpu.dimension_semantics<arbitrary>], iteration_bounds = array<i64: 2, 2>, scalar_prefetch = 0 : i64, scratch_operands = 0 : i64, tpu.core_type = #tpu.core_type<tc>, window_params = [{transform_indices = @transform_0, window_bounds = array<i64: 1, 18, 18, 4>}, {pipeline_mode = #tpu.pipeline_mode<synchronous>, transform_indices = @transform_1, window_bounds = array<i64: 9, 4, 8>}, {transform_indices = @transform_2, window_bounds = array<i64: 1, 2, 8>}]} {
    %c0_i32 = arith.constant 0 : i32
    %0 = arith.cmpi eq, %arg1, %c0_i32 : i32
    %1 = arith.extui %0 : i1 to i32
    %c0_i32_0 = arith.constant 0 : i32
    %2 = arith.cmpi ne, %1, %c0_i32_0 : i32
    scf.if %2 {
      %cst_76 = arith.constant 0.000000e+00 : f32
      %104 = vector.broadcast %cst_76 : f32 to vector<2x8xf32>
      %c0_77 = arith.constant 0 : index
      %c0_78 = arith.constant 0 : index
      %c0_79 = arith.constant 0 : index
      %105 = vector.load %arg4[%c0_77, %c0_78, %c0_79] : memref<1x2x8xf32, #tpu.memory_space<vmem>>, vector<1x2x8xf32>
      %106 = vector.shape_cast %105 : vector<1x2x8xf32> to vector<2x8xf32>
      %107 = vector.shape_cast %104 : vector<2x8xf32> to vector<1x2x8xf32>
      tpu.vector_store %arg4[%c0_77, %c0_78, %c0_79], %107 {strides = array<i32>} : memref<1x2x8xf32, #tpu.memory_space<vmem>>, vector<1x2x8xf32>,
    } else {
    }
    %c8_i32 = arith.constant 8 : i32
    %3 = arith.muli %arg1, %c8_i32 : i32
    %4 = tpu.assume_multiple %3, 8 : i32
    %cst = arith.constant 0.000000e+00 : f32
    %5 = vector.broadcast %cst : f32 to vector<128x8xf32>
    %c0_i32_1 = arith.constant 0 : i32
    %6 = arith.addi %4, %c0_i32_1 : i32
    %c0 = arith.constant 0 : index
    %7 = arith.index_cast %6 : i32 to index
    %c0_2 = arith.constant 0 : index
    %c0_3 = arith.constant 0 : index
    %8 = vector.load %arg2[%c0, %7, %c0_2, %c0_3] : memref<1x18x18x4xf32, #tpu.memory_space<vmem>>, vector<1x8x16x4xf32>
    %9 = vector.shape_cast %8 : vector<1x8x16x4xf32> to vector<8x16x4xf32>
    %10 = vector.shape_cast %9 : vector<8x16x4xf32> to vector<128x4xf32>
    %c0_4 = arith.constant 0 : index
    %c0_5 = arith.constant 0 : index
    %c0_6 = arith.constant 0 : index
    %11 = vector.load %arg3[%c0_4, %c0_5, %c0_6] : memref<9x4x8xf32, #tpu.memory_space<vmem>>, vector<1x4x8xf32>
    %12 = vector.shape_cast %11 : vector<1x4x8xf32> to vector<4x8xf32>
    %cst_7 = arith.constant dense<0.000000e+00> : vector<128x8xf32>
    %13 = tpu.matmul %10, %12, %cst_7 {dimension_numbers = #tpu.dot_dimension_numbers<[1], [0], [0], [1], [0, 0, 1, 1], [], []>} : vector<128x4xf32>, vector<4x8xf32>, vector<128x8xf32> -> vector<128x8xf32>
    %14 = arith.addf %5, %13 : vector<128x8xf32>
    %c0_i32_8 = arith.constant 0 : i32
    %15 = arith.addi %4, %c0_i32_8 : i32
    %c0_9 = arith.constant 0 : index
    %16 = arith.index_cast %15 : i32 to index
    %c1 = arith.constant 1 : index
    %c0_10 = arith.constant 0 : index
    %17 = vector.load %arg2[%c0_9, %16, %c1, %c0_10] : memref<1x18x18x4xf32, #tpu.memory_space<vmem>>, vector<1x8x16x4xf32>
    %18 = vector.shape_cast %17 : vector<1x8x16x4xf32> to vector<8x16x4xf32>
    %19 = vector.shape_cast %18 : vector<8x16x4xf32> to vector<128x4xf32>
    %c1_11 = arith.constant 1 : index
    %c0_12 = arith.constant 0 : index
    %c0_13 = arith.constant 0 : index
    %20 = vector.load %arg3[%c1_11, %c0_12, %c0_13] : memref<9x4x8xf32, #tpu.memory_space<vmem>>, vector<1x4x8xf32>
    %21 = vector.shape_cast %20 : vector<1x4x8xf32> to vector<4x8xf32>
    %cst_14 = arith.constant dense<0.000000e+00> : vector<128x8xf32>
    %22 = tpu.matmul %19, %21, %cst_14 {dimension_numbers = #tpu.dot_dimension_numbers<[1], [0], [0], [1], [0, 0, 1, 1], [], []>} : vector<128x4xf32>, vector<4x8xf32>, vector<128x8xf32> -> vector<128x8xf32>
    %23 = arith.addf %14, %22 : vector<128x8xf32>
    %c0_i32_15 = arith.constant 0 : i32
    %24 = arith.addi %4, %c0_i32_15 : i32
    %c0_16 = arith.constant 0 : index
    %25 = arith.index_cast %24 : i32 to index
    %c2 = arith.constant 2 : index
    %c0_17 = arith.constant 0 : index
    %26 = vector.load %arg2[%c0_16, %25, %c2, %c0_17] : memref<1x18x18x4xf32, #tpu.memory_space<vmem>>, vector<1x8x16x4xf32>
    %27 = vector.shape_cast %26 : vector<1x8x16x4xf32> to vector<8x16x4xf32>
    %28 = vector.shape_cast %27 : vector<8x16x4xf32> to vector<128x4xf32>
    %c2_18 = arith.constant 2 : index
    %c0_19 = arith.constant 0 : index
    %c0_20 = arith.constant 0 : index
    %29 = vector.load %arg3[%c2_18, %c0_19, %c0_20] : memref<9x4x8xf32, #tpu.memory_space<vmem>>, vector<1x4x8xf32>
    %30 = vector.shape_cast %29 : vector<1x4x8xf32> to vector<4x8xf32>
    %cst_21 = arith.constant dense<0.000000e+00> : vector<128x8xf32>
    %31 = tpu.matmul %28, %30, %cst_21 {dimension_numbers = #tpu.dot_dimension_numbers<[1], [0], [0], [1], [0, 0, 1, 1], [], []>} : vector<128x4xf32>, vector<4x8xf32>, vector<128x8xf32> -> vector<128x8xf32>
    %32 = arith.addf %23, %31 : vector<128x8xf32>
    %c1_i32 = arith.constant 1 : i32
    %33 = arith.addi %4, %c1_i32 : i32
    %c0_22 = arith.constant 0 : index
    %34 = arith.index_cast %33 : i32 to index
    %c0_23 = arith.constant 0 : index
    %c0_24 = arith.constant 0 : index
    %35 = vector.load %arg2[%c0_22, %34, %c0_23, %c0_24] : memref<1x18x18x4xf32, #tpu.memory_space<vmem>>, vector<1x8x16x4xf32>
    %36 = vector.shape_cast %35 : vector<1x8x16x4xf32> to vector<8x16x4xf32>
    %37 = vector.shape_cast %36 : vector<8x16x4xf32> to vector<128x4xf32>
    %c3 = arith.constant 3 : index
    %c0_25 = arith.constant 0 : index
    %c0_26 = arith.constant 0 : index
    %38 = vector.load %arg3[%c3, %c0_25, %c0_26] : memref<9x4x8xf32, #tpu.memory_space<vmem>>, vector<1x4x8xf32>
    %39 = vector.shape_cast %38 : vector<1x4x8xf32> to vector<4x8xf32>
    %cst_27 = arith.constant dense<0.000000e+00> : vector<128x8xf32>
    %40 = tpu.matmul %37, %39, %cst_27 {dimension_numbers = #tpu.dot_dimension_numbers<[1], [0], [0], [1], [0, 0, 1, 1], [], []>} : vector<128x4xf32>, vector<4x8xf32>, vector<128x8xf32> -> vector<128x8xf32>
    %41 = arith.addf %32, %40 : vector<128x8xf32>
    %c1_i32_28 = arith.constant 1 : i32
    %42 = arith.addi %4, %c1_i32_28 : i32
    %c0_29 = arith.constant 0 : index
    %43 = arith.index_cast %42 : i32 to index
    %c1_30 = arith.constant 1 : index
    %c0_31 = arith.constant 0 : index
    %44 = vector.load %arg2[%c0_29, %43, %c1_30, %c0_31] : memref<1x18x18x4xf32, #tpu.memory_space<vmem>>, vector<1x8x16x4xf32>
    %45 = vector.shape_cast %44 : vector<1x8x16x4xf32> to vector<8x16x4xf32>
    %46 = vector.shape_cast %45 : vector<8x16x4xf32> to vector<128x4xf32>
    %c4 = arith.constant 4 : index
    %c0_32 = arith.constant 0 : index
    %c0_33 = arith.constant 0 : index
    %47 = vector.load %arg3[%c4, %c0_32, %c0_33] : memref<9x4x8xf32, #tpu.memory_space<vmem>>, vector<1x4x8xf32>
    %48 = vector.shape_cast %47 : vector<1x4x8xf32> to vector<4x8xf32>
    %cst_34 = arith.constant dense<0.000000e+00> : vector<128x8xf32>
    %49 = tpu.matmul %46, %48, %cst_34 {dimension_numbers = #tpu.dot_dimension_numbers<[1], [0], [0], [1], [0, 0, 1, 1], [], []>} : vector<128x4xf32>, vector<4x8xf32>, vector<128x8xf32> -> vector<128x8xf32>
    %50 = arith.addf %41, %49 : vector<128x8xf32>
    %c1_i32_35 = arith.constant 1 : i32
    %51 = arith.addi %4, %c1_i32_35 : i32
    %c0_36 = arith.constant 0 : index
    %52 = arith.index_cast %51 : i32 to index
    %c2_37 = arith.constant 2 : index
    %c0_38 = arith.constant 0 : index
    %53 = vector.load %arg2[%c0_36, %52, %c2_37, %c0_38] : memref<1x18x18x4xf32, #tpu.memory_space<vmem>>, vector<1x8x16x4xf32>
    %54 = vector.shape_cast %53 : vector<1x8x16x4xf32> to vector<8x16x4xf32>
    %55 = vector.shape_cast %54 : vector<8x16x4xf32> to vector<128x4xf32>
    %c5 = arith.constant 5 : index
    %c0_39 = arith.constant 0 : index
    %c0_40 = arith.constant 0 : index
    %56 = vector.load %arg3[%c5, %c0_39, %c0_40] : memref<9x4x8xf32, #tpu.memory_space<vmem>>, vector<1x4x8xf32>
    %57 = vector.shape_cast %56 : vector<1x4x8xf32> to vector<4x8xf32>
    %cst_41 = arith.constant dense<0.000000e+00> : vector<128x8xf32>
    %58 = tpu.matmul %55, %57, %cst_41 {dimension_numbers = #tpu.dot_dimension_numbers<[1], [0], [0], [1], [0, 0, 1, 1], [], []>} : vector<128x4xf32>, vector<4x8xf32>, vector<128x8xf32> -> vector<128x8xf32>
    %59 = arith.addf %50, %58 : vector<128x8xf32>
    %c2_i32 = arith.constant 2 : i32
    %60 = arith.addi %4, %c2_i32 : i32
    %c0_42 = arith.constant 0 : index
    %61 = arith.index_cast %60 : i32 to index
    %c0_43 = arith.constant 0 : index
    %c0_44 = arith.constant 0 : index
    %62 = vector.load %arg2[%c0_42, %61, %c0_43, %c0_44] : memref<1x18x18x4xf32, #tpu.memory_space<vmem>>, vector<1x8x16x4xf32>
    %63 = vector.shape_cast %62 : vector<1x8x16x4xf32> to vector<8x16x4xf32>
    %64 = vector.shape_cast %63 : vector<8x16x4xf32> to vector<128x4xf32>
    %c6 = arith.constant 6 : index
    %c0_45 = arith.constant 0 : index
    %c0_46 = arith.constant 0 : index
    %65 = vector.load %arg3[%c6, %c0_45, %c0_46] : memref<9x4x8xf32, #tpu.memory_space<vmem>>, vector<1x4x8xf32>
    %66 = vector.shape_cast %65 : vector<1x4x8xf32> to vector<4x8xf32>
    %cst_47 = arith.constant dense<0.000000e+00> : vector<128x8xf32>
    %67 = tpu.matmul %64, %66, %cst_47 {dimension_numbers = #tpu.dot_dimension_numbers<[1], [0], [0], [1], [0, 0, 1, 1], [], []>} : vector<128x4xf32>, vector<4x8xf32>, vector<128x8xf32> -> vector<128x8xf32>
    %68 = arith.addf %59, %67 : vector<128x8xf32>
    %c2_i32_48 = arith.constant 2 : i32
    %69 = arith.addi %4, %c2_i32_48 : i32
    %c0_49 = arith.constant 0 : index
    %70 = arith.index_cast %69 : i32 to index
    %c1_50 = arith.constant 1 : index
    %c0_51 = arith.constant 0 : index
    %71 = vector.load %arg2[%c0_49, %70, %c1_50, %c0_51] : memref<1x18x18x4xf32, #tpu.memory_space<vmem>>, vector<1x8x16x4xf32>
    %72 = vector.shape_cast %71 : vector<1x8x16x4xf32> to vector<8x16x4xf32>
    %73 = vector.shape_cast %72 : vector<8x16x4xf32> to vector<128x4xf32>
    %c7 = arith.constant 7 : index
    %c0_52 = arith.constant 0 : index
    %c0_53 = arith.constant 0 : index
    %74 = vector.load %arg3[%c7, %c0_52, %c0_53] : memref<9x4x8xf32, #tpu.memory_space<vmem>>, vector<1x4x8xf32>
    %75 = vector.shape_cast %74 : vector<1x4x8xf32> to vector<4x8xf32>
    %cst_54 = arith.constant dense<0.000000e+00> : vector<128x8xf32>
    %76 = tpu.matmul %73, %75, %cst_54 {dimension_numbers = #tpu.dot_dimension_numbers<[1], [0], [0], [1], [0, 0, 1, 1], [], []>} : vector<128x4xf32>, vector<4x8xf32>, vector<128x8xf32> -> vector<128x8xf32>
    %77 = arith.addf %68, %76 : vector<128x8xf32>
    %c2_i32_55 = arith.constant 2 : i32
    %78 = arith.addi %4, %c2_i32_55 : i32
    %c0_56 = arith.constant 0 : index
    %79 = arith.index_cast %78 : i32 to index
    %c2_57 = arith.constant 2 : index
    %c0_58 = arith.constant 0 : index
    %80 = vector.load %arg2[%c0_56, %79, %c2_57, %c0_58] : memref<1x18x18x4xf32, #tpu.memory_space<vmem>>, vector<1x8x16x4xf32>
    %81 = vector.shape_cast %80 : vector<1x8x16x4xf32> to vector<8x16x4xf32>
    %82 = vector.shape_cast %81 : vector<8x16x4xf32> to vector<128x4xf32>
    %c8 = arith.constant 8 : index
    %c0_59 = arith.constant 0 : index
    %c0_60 = arith.constant 0 : index
    %83 = vector.load %arg3[%c8, %c0_59, %c0_60] : memref<9x4x8xf32, #tpu.memory_space<vmem>>, vector<1x4x8xf32>
    %84 = vector.shape_cast %83 : vector<1x4x8xf32> to vector<4x8xf32>
    %cst_61 = arith.constant dense<0.000000e+00> : vector<128x8xf32>
    %85 = tpu.matmul %82, %84, %cst_61 {dimension_numbers = #tpu.dot_dimension_numbers<[1], [0], [0], [1], [0, 0, 1, 1], [], []>} : vector<128x4xf32>, vector<4x8xf32>, vector<128x8xf32> -> vector<128x8xf32>
    %86 = arith.addf %77, %85 : vector<128x8xf32>
    %cst_62 = arith.constant dense<0.000000e+00> : vector<8xf32>
    %87 = vector.multi_reduction <add>, %86, %cst_62 [0] : vector<128x8xf32> to vector<8xf32>
    %88 = vector.shape_cast %87 : vector<8xf32> to vector<1x8xf32>
    %89 = arith.mulf %86, %86 : vector<128x8xf32>
    %cst_63 = arith.constant dense<0.000000e+00> : vector<8xf32>
    %90 = vector.multi_reduction <add>, %89, %cst_63 [0] : vector<128x8xf32> to vector<8xf32>
    %91 = vector.shape_cast %90 : vector<8xf32> to vector<1x8xf32>
    %c0_64 = arith.constant 0 : index
    %c0_65 = arith.constant 0 : index
    %c0_66 = arith.constant 0 : index
    %92 = vector.load %arg4[%c0_64, %c0_65, %c0_66] : memref<1x2x8xf32, #tpu.memory_space<vmem>>, vector<1x1x8xf32>
    %93 = vector.shape_cast %92 : vector<1x1x8xf32> to vector<1x8xf32>
    %94 = arith.addf %93, %88 : vector<1x8xf32>
    %c0_67 = arith.constant 0 : index
    %c0_68 = arith.constant 0 : index
    %c0_69 = arith.constant 0 : index
    %95 = vector.load %arg4[%c0_67, %c0_68, %c0_69] : memref<1x2x8xf32, #tpu.memory_space<vmem>>, vector<1x1x8xf32>
    %96 = vector.shape_cast %95 : vector<1x1x8xf32> to vector<1x8xf32>
    %97 = vector.shape_cast %94 : vector<1x8xf32> to vector<1x1x8xf32>
    tpu.vector_store %arg4[%c0_67, %c0_68, %c0_69], %97 {strides = array<i32>} : memref<1x2x8xf32, #tpu.memory_space<vmem>>, vector<1x1x8xf32>,
    %c0_70 = arith.constant 0 : index
    %c1_71 = arith.constant 1 : index
    %c0_72 = arith.constant 0 : index
    %98 = vector.load %arg4[%c0_70, %c1_71, %c0_72] : memref<1x2x8xf32, #tpu.memory_space<vmem>>, vector<1x1x8xf32>
    %99 = vector.shape_cast %98 : vector<1x1x8xf32> to vector<1x8xf32>
    %100 = arith.addf %99, %91 : vector<1x8xf32>
    %c0_73 = arith.constant 0 : index
    %c1_74 = arith.constant 1 : index
    %c0_75 = arith.constant 0 : index
    %101 = vector.load %arg4[%c0_73, %c1_74, %c0_75] : memref<1x2x8xf32, #tpu.memory_space<vmem>>, vector<1x1x8xf32>
    %102 = vector.shape_cast %101 : vector<1x1x8xf32> to vector<1x8xf32>
    %103 = vector.shape_cast %100 : vector<1x8xf32> to vector<1x1x8xf32>
    tpu.vector_store %arg4[%c0_73, %c1_74, %c0_75], %103 {strides = array<i32>} : memref<1x2x8xf32, #tpu.memory_space<vmem>>, vector<1x1x8xf32>,
    return
  }
  func.func @transform_0(%arg0: i32, %arg1: i32) -> (i32, i32, i32, i32) {
    %c0_i32 = arith.constant 0 : i32
    %c0_i32_0 = arith.constant 0 : i32
    %c0_i32_1 = arith.constant 0 : i32
    %c0_i32_2 = arith.constant 0 : i32
    return %arg0, %c0_i32, %c0_i32_0, %c0_i32_1 : i32, i32, i32, i32
  }
  func.func @transform_1(%arg0: i32, %arg1: i32) -> (i32, i32, i32) {
    %c0_i32 = arith.constant 0 : i32
    %c0_i32_0 = arith.constant 0 : i32
    %c0_i32_1 = arith.constant 0 : i32
    %c0_i32_2 = arith.constant 0 : i32
    return %c0_i32, %c0_i32_0, %c0_i32_1 : i32, i32, i32
  }
  func.func @transform_2(%arg0: i32, %arg1: i32) -> (i32, i32, i32) {
    %c0_i32 = arith.constant 0 : i32
    %c0_i32_0 = arith.constant 0 : i32
    %c0_i32_1 = arith.constant 0 : i32
    return %arg0, %c0_i32, %c0_i32_0 : i32, i32, i32
  }
}

module attributes {stable_mosaic.version = 11 : i64} {
  func.func @_norm_kernel(%arg0: i32, %arg1: i32, %arg2: memref<1x18x18x4xf32, #tpu.memory_space<vmem>>, %arg3: memref<9x4x8xf32, #tpu.memory_space<vmem>>, %arg4: memref<1x8xf32, #tpu.memory_space<vmem>>, %arg5: memref<1x8xf32, #tpu.memory_space<vmem>>, %arg6: memref<1x8x16x8xf32, #tpu.memory_space<vmem>>) attributes {dimension_semantics = [#tpu.dimension_semantics<parallel>, #tpu.dimension_semantics<parallel>], iteration_bounds = array<i64: 2, 2>, scalar_prefetch = 0 : i64, scratch_operands = 0 : i64, tpu.core_type = #tpu.core_type<tc>, window_params = [{transform_indices = @transform_0, window_bounds = array<i64: 1, 18, 18, 4>}, {pipeline_mode = #tpu.pipeline_mode<synchronous>, transform_indices = @transform_1, window_bounds = array<i64: 9, 4, 8>}, {pipeline_mode = #tpu.pipeline_mode<synchronous>, transform_indices = @transform_2, window_bounds = array<i64: 1, 8>}, {pipeline_mode = #tpu.pipeline_mode<synchronous>, transform_indices = @transform_3, window_bounds = array<i64: 1, 8>}, {transform_indices = @transform_4, window_bounds = array<i64: 1, 8, 16, 8>}]} {
    %c8_i32 = arith.constant 8 : i32
    %0 = arith.muli %arg1, %c8_i32 : i32
    %1 = tpu.assume_multiple %0, 8 : i32
    %cst = arith.constant 0.000000e+00 : f32
    %2 = vector.broadcast %cst : f32 to vector<128x8xf32>
    %c0_i32 = arith.constant 0 : i32
    %3 = arith.addi %1, %c0_i32 : i32
    %c0 = arith.constant 0 : index
    %4 = arith.index_cast %3 : i32 to index
    %c0_0 = arith.constant 0 : index
    %c0_1 = arith.constant 0 : index
    %5 = vector.load %arg2[%c0, %4, %c0_0, %c0_1] : memref<1x18x18x4xf32, #tpu.memory_space<vmem>>, vector<1x8x16x4xf32>
    %6 = vector.shape_cast %5 : vector<1x8x16x4xf32> to vector<8x16x4xf32>
    %7 = vector.shape_cast %6 : vector<8x16x4xf32> to vector<128x4xf32>
    %c0_2 = arith.constant 0 : index
    %c0_3 = arith.constant 0 : index
    %c0_4 = arith.constant 0 : index
    %8 = vector.load %arg3[%c0_2, %c0_3, %c0_4] : memref<9x4x8xf32, #tpu.memory_space<vmem>>, vector<1x4x8xf32>
    %9 = vector.shape_cast %8 : vector<1x4x8xf32> to vector<4x8xf32>
    %cst_5 = arith.constant dense<0.000000e+00> : vector<128x8xf32>
    %10 = tpu.matmul %7, %9, %cst_5 {dimension_numbers = #tpu.dot_dimension_numbers<[1], [0], [0], [1], [0, 0, 1, 1], [], []>} : vector<128x4xf32>, vector<4x8xf32>, vector<128x8xf32> -> vector<128x8xf32>
    %11 = arith.addf %2, %10 : vector<128x8xf32>
    %c0_i32_6 = arith.constant 0 : i32
    %12 = arith.addi %1, %c0_i32_6 : i32
    %c0_7 = arith.constant 0 : index
    %13 = arith.index_cast %12 : i32 to index
    %c1 = arith.constant 1 : index
    %c0_8 = arith.constant 0 : index
    %14 = vector.load %arg2[%c0_7, %13, %c1, %c0_8] : memref<1x18x18x4xf32, #tpu.memory_space<vmem>>, vector<1x8x16x4xf32>
    %15 = vector.shape_cast %14 : vector<1x8x16x4xf32> to vector<8x16x4xf32>
    %16 = vector.shape_cast %15 : vector<8x16x4xf32> to vector<128x4xf32>
    %c1_9 = arith.constant 1 : index
    %c0_10 = arith.constant 0 : index
    %c0_11 = arith.constant 0 : index
    %17 = vector.load %arg3[%c1_9, %c0_10, %c0_11] : memref<9x4x8xf32, #tpu.memory_space<vmem>>, vector<1x4x8xf32>
    %18 = vector.shape_cast %17 : vector<1x4x8xf32> to vector<4x8xf32>
    %cst_12 = arith.constant dense<0.000000e+00> : vector<128x8xf32>
    %19 = tpu.matmul %16, %18, %cst_12 {dimension_numbers = #tpu.dot_dimension_numbers<[1], [0], [0], [1], [0, 0, 1, 1], [], []>} : vector<128x4xf32>, vector<4x8xf32>, vector<128x8xf32> -> vector<128x8xf32>
    %20 = arith.addf %11, %19 : vector<128x8xf32>
    %c0_i32_13 = arith.constant 0 : i32
    %21 = arith.addi %1, %c0_i32_13 : i32
    %c0_14 = arith.constant 0 : index
    %22 = arith.index_cast %21 : i32 to index
    %c2 = arith.constant 2 : index
    %c0_15 = arith.constant 0 : index
    %23 = vector.load %arg2[%c0_14, %22, %c2, %c0_15] : memref<1x18x18x4xf32, #tpu.memory_space<vmem>>, vector<1x8x16x4xf32>
    %24 = vector.shape_cast %23 : vector<1x8x16x4xf32> to vector<8x16x4xf32>
    %25 = vector.shape_cast %24 : vector<8x16x4xf32> to vector<128x4xf32>
    %c2_16 = arith.constant 2 : index
    %c0_17 = arith.constant 0 : index
    %c0_18 = arith.constant 0 : index
    %26 = vector.load %arg3[%c2_16, %c0_17, %c0_18] : memref<9x4x8xf32, #tpu.memory_space<vmem>>, vector<1x4x8xf32>
    %27 = vector.shape_cast %26 : vector<1x4x8xf32> to vector<4x8xf32>
    %cst_19 = arith.constant dense<0.000000e+00> : vector<128x8xf32>
    %28 = tpu.matmul %25, %27, %cst_19 {dimension_numbers = #tpu.dot_dimension_numbers<[1], [0], [0], [1], [0, 0, 1, 1], [], []>} : vector<128x4xf32>, vector<4x8xf32>, vector<128x8xf32> -> vector<128x8xf32>
    %29 = arith.addf %20, %28 : vector<128x8xf32>
    %c1_i32 = arith.constant 1 : i32
    %30 = arith.addi %1, %c1_i32 : i32
    %c0_20 = arith.constant 0 : index
    %31 = arith.index_cast %30 : i32 to index
    %c0_21 = arith.constant 0 : index
    %c0_22 = arith.constant 0 : index
    %32 = vector.load %arg2[%c0_20, %31, %c0_21, %c0_22] : memref<1x18x18x4xf32, #tpu.memory_space<vmem>>, vector<1x8x16x4xf32>
    %33 = vector.shape_cast %32 : vector<1x8x16x4xf32> to vector<8x16x4xf32>
    %34 = vector.shape_cast %33 : vector<8x16x4xf32> to vector<128x4xf32>
    %c3 = arith.constant 3 : index
    %c0_23 = arith.constant 0 : index
    %c0_24 = arith.constant 0 : index
    %35 = vector.load %arg3[%c3, %c0_23, %c0_24] : memref<9x4x8xf32, #tpu.memory_space<vmem>>, vector<1x4x8xf32>
    %36 = vector.shape_cast %35 : vector<1x4x8xf32> to vector<4x8xf32>
    %cst_25 = arith.constant dense<0.000000e+00> : vector<128x8xf32>
    %37 = tpu.matmul %34, %36, %cst_25 {dimension_numbers = #tpu.dot_dimension_numbers<[1], [0], [0], [1], [0, 0, 1, 1], [], []>} : vector<128x4xf32>, vector<4x8xf32>, vector<128x8xf32> -> vector<128x8xf32>
    %38 = arith.addf %29, %37 : vector<128x8xf32>
    %c1_i32_26 = arith.constant 1 : i32
    %39 = arith.addi %1, %c1_i32_26 : i32
    %c0_27 = arith.constant 0 : index
    %40 = arith.index_cast %39 : i32 to index
    %c1_28 = arith.constant 1 : index
    %c0_29 = arith.constant 0 : index
    %41 = vector.load %arg2[%c0_27, %40, %c1_28, %c0_29] : memref<1x18x18x4xf32, #tpu.memory_space<vmem>>, vector<1x8x16x4xf32>
    %42 = vector.shape_cast %41 : vector<1x8x16x4xf32> to vector<8x16x4xf32>
    %43 = vector.shape_cast %42 : vector<8x16x4xf32> to vector<128x4xf32>
    %c4 = arith.constant 4 : index
    %c0_30 = arith.constant 0 : index
    %c0_31 = arith.constant 0 : index
    %44 = vector.load %arg3[%c4, %c0_30, %c0_31] : memref<9x4x8xf32, #tpu.memory_space<vmem>>, vector<1x4x8xf32>
    %45 = vector.shape_cast %44 : vector<1x4x8xf32> to vector<4x8xf32>
    %cst_32 = arith.constant dense<0.000000e+00> : vector<128x8xf32>
    %46 = tpu.matmul %43, %45, %cst_32 {dimension_numbers = #tpu.dot_dimension_numbers<[1], [0], [0], [1], [0, 0, 1, 1], [], []>} : vector<128x4xf32>, vector<4x8xf32>, vector<128x8xf32> -> vector<128x8xf32>
    %47 = arith.addf %38, %46 : vector<128x8xf32>
    %c1_i32_33 = arith.constant 1 : i32
    %48 = arith.addi %1, %c1_i32_33 : i32
    %c0_34 = arith.constant 0 : index
    %49 = arith.index_cast %48 : i32 to index
    %c2_35 = arith.constant 2 : index
    %c0_36 = arith.constant 0 : index
    %50 = vector.load %arg2[%c0_34, %49, %c2_35, %c0_36] : memref<1x18x18x4xf32, #tpu.memory_space<vmem>>, vector<1x8x16x4xf32>
    %51 = vector.shape_cast %50 : vector<1x8x16x4xf32> to vector<8x16x4xf32>
    %52 = vector.shape_cast %51 : vector<8x16x4xf32> to vector<128x4xf32>
    %c5 = arith.constant 5 : index
    %c0_37 = arith.constant 0 : index
    %c0_38 = arith.constant 0 : index
    %53 = vector.load %arg3[%c5, %c0_37, %c0_38] : memref<9x4x8xf32, #tpu.memory_space<vmem>>, vector<1x4x8xf32>
    %54 = vector.shape_cast %53 : vector<1x4x8xf32> to vector<4x8xf32>
    %cst_39 = arith.constant dense<0.000000e+00> : vector<128x8xf32>
    %55 = tpu.matmul %52, %54, %cst_39 {dimension_numbers = #tpu.dot_dimension_numbers<[1], [0], [0], [1], [0, 0, 1, 1], [], []>} : vector<128x4xf32>, vector<4x8xf32>, vector<128x8xf32> -> vector<128x8xf32>
    %56 = arith.addf %47, %55 : vector<128x8xf32>
    %c2_i32 = arith.constant 2 : i32
    %57 = arith.addi %1, %c2_i32 : i32
    %c0_40 = arith.constant 0 : index
    %58 = arith.index_cast %57 : i32 to index
    %c0_41 = arith.constant 0 : index
    %c0_42 = arith.constant 0 : index
    %59 = vector.load %arg2[%c0_40, %58, %c0_41, %c0_42] : memref<1x18x18x4xf32, #tpu.memory_space<vmem>>, vector<1x8x16x4xf32>
    %60 = vector.shape_cast %59 : vector<1x8x16x4xf32> to vector<8x16x4xf32>
    %61 = vector.shape_cast %60 : vector<8x16x4xf32> to vector<128x4xf32>
    %c6 = arith.constant 6 : index
    %c0_43 = arith.constant 0 : index
    %c0_44 = arith.constant 0 : index
    %62 = vector.load %arg3[%c6, %c0_43, %c0_44] : memref<9x4x8xf32, #tpu.memory_space<vmem>>, vector<1x4x8xf32>
    %63 = vector.shape_cast %62 : vector<1x4x8xf32> to vector<4x8xf32>
    %cst_45 = arith.constant dense<0.000000e+00> : vector<128x8xf32>
    %64 = tpu.matmul %61, %63, %cst_45 {dimension_numbers = #tpu.dot_dimension_numbers<[1], [0], [0], [1], [0, 0, 1, 1], [], []>} : vector<128x4xf32>, vector<4x8xf32>, vector<128x8xf32> -> vector<128x8xf32>
    %65 = arith.addf %56, %64 : vector<128x8xf32>
    %c2_i32_46 = arith.constant 2 : i32
    %66 = arith.addi %1, %c2_i32_46 : i32
    %c0_47 = arith.constant 0 : index
    %67 = arith.index_cast %66 : i32 to index
    %c1_48 = arith.constant 1 : index
    %c0_49 = arith.constant 0 : index
    %68 = vector.load %arg2[%c0_47, %67, %c1_48, %c0_49] : memref<1x18x18x4xf32, #tpu.memory_space<vmem>>, vector<1x8x16x4xf32>
    %69 = vector.shape_cast %68 : vector<1x8x16x4xf32> to vector<8x16x4xf32>
    %70 = vector.shape_cast %69 : vector<8x16x4xf32> to vector<128x4xf32>
    %c7 = arith.constant 7 : index
    %c0_50 = arith.constant 0 : index
    %c0_51 = arith.constant 0 : index
    %71 = vector.load %arg3[%c7, %c0_50, %c0_51] : memref<9x4x8xf32, #tpu.memory_space<vmem>>, vector<1x4x8xf32>
    %72 = vector.shape_cast %71 : vector<1x4x8xf32> to vector<4x8xf32>
    %cst_52 = arith.constant dense<0.000000e+00> : vector<128x8xf32>
    %73 = tpu.matmul %70, %72, %cst_52 {dimension_numbers = #tpu.dot_dimension_numbers<[1], [0], [0], [1], [0, 0, 1, 1], [], []>} : vector<128x4xf32>, vector<4x8xf32>, vector<128x8xf32> -> vector<128x8xf32>
    %74 = arith.addf %65, %73 : vector<128x8xf32>
    %c2_i32_53 = arith.constant 2 : i32
    %75 = arith.addi %1, %c2_i32_53 : i32
    %c0_54 = arith.constant 0 : index
    %76 = arith.index_cast %75 : i32 to index
    %c2_55 = arith.constant 2 : index
    %c0_56 = arith.constant 0 : index
    %77 = vector.load %arg2[%c0_54, %76, %c2_55, %c0_56] : memref<1x18x18x4xf32, #tpu.memory_space<vmem>>, vector<1x8x16x4xf32>
    %78 = vector.shape_cast %77 : vector<1x8x16x4xf32> to vector<8x16x4xf32>
    %79 = vector.shape_cast %78 : vector<8x16x4xf32> to vector<128x4xf32>
    %c8 = arith.constant 8 : index
    %c0_57 = arith.constant 0 : index
    %c0_58 = arith.constant 0 : index
    %80 = vector.load %arg3[%c8, %c0_57, %c0_58] : memref<9x4x8xf32, #tpu.memory_space<vmem>>, vector<1x4x8xf32>
    %81 = vector.shape_cast %80 : vector<1x4x8xf32> to vector<4x8xf32>
    %cst_59 = arith.constant dense<0.000000e+00> : vector<128x8xf32>
    %82 = tpu.matmul %79, %81, %cst_59 {dimension_numbers = #tpu.dot_dimension_numbers<[1], [0], [0], [1], [0, 0, 1, 1], [], []>} : vector<128x4xf32>, vector<4x8xf32>, vector<128x8xf32> -> vector<128x8xf32>
    %83 = arith.addf %74, %82 : vector<128x8xf32>
    %c0_60 = arith.constant 0 : index
    %c0_61 = arith.constant 0 : index
    %84 = vector.load %arg4[%c0_60, %c0_61] : memref<1x8xf32, #tpu.memory_space<vmem>>, vector<1x8xf32>
    %85 = vector.broadcast %84 : vector<1x8xf32> to vector<128x8xf32>
    %86 = arith.mulf %83, %85 : vector<128x8xf32>
    %c0_62 = arith.constant 0 : index
    %c0_63 = arith.constant 0 : index
    %87 = vector.load %arg5[%c0_62, %c0_63] : memref<1x8xf32, #tpu.memory_space<vmem>>, vector<1x8xf32>
    %88 = vector.broadcast %87 : vector<1x8xf32> to vector<128x8xf32>
    %89 = arith.addf %86, %88 : vector<128x8xf32>
    %cst_64 = arith.constant 0.000000e+00 : f32
    %90 = vector.broadcast %cst_64 : f32 to vector<128x8xf32>
    %91 = arith.cmpf ogt, %89, %90 : vector<128x8xf32>
    %cst_65 = arith.constant 1.000000e-01 : f32
    %92 = vector.broadcast %cst_65 : f32 to vector<128x8xf32>
    %93 = arith.mulf %92, %89 : vector<128x8xf32>
    %94 = arith.select %91, %89, %93 : vector<128x8xi1>, vector<128x8xf32>
    %95 = vector.shape_cast %94 : vector<128x8xf32> to vector<8x16x8xf32>
    %c0_66 = arith.constant 0 : index
    %c0_67 = arith.constant 0 : index
    %c0_68 = arith.constant 0 : index
    %c0_69 = arith.constant 0 : index
    %96 = vector.load %arg6[%c0_66, %c0_67, %c0_68, %c0_69] : memref<1x8x16x8xf32, #tpu.memory_space<vmem>>, vector<1x8x16x8xf32>
    %97 = vector.shape_cast %96 : vector<1x8x16x8xf32> to vector<8x16x8xf32>
    %98 = vector.shape_cast %95 : vector<8x16x8xf32> to vector<1x8x16x8xf32>
    tpu.vector_store %arg6[%c0_66, %c0_67, %c0_68, %c0_69], %98 {strides = array<i32>} : memref<1x8x16x8xf32, #tpu.memory_space<vmem>>, vector<1x8x16x8xf32>,
    return
  }
  func.func @transform_0(%arg0: i32, %arg1: i32) -> (i32, i32, i32, i32) {
    %c0_i32 = arith.constant 0 : i32
    %c0_i32_0 = arith.constant 0 : i32
    %c0_i32_1 = arith.constant 0 : i32
    %c0_i32_2 = arith.constant 0 : i32
    return %arg0, %c0_i32, %c0_i32_0, %c0_i32_1 : i32, i32, i32, i32
  }
  func.func @transform_1(%arg0: i32, %arg1: i32) -> (i32, i32, i32) {
    %c0_i32 = arith.constant 0 : i32
    %c0_i32_0 = arith.constant 0 : i32
    %c0_i32_1 = arith.constant 0 : i32
    %c0_i32_2 = arith.constant 0 : i32
    return %c0_i32, %c0_i32_0, %c0_i32_1 : i32, i32, i32
  }
  func.func @transform_2(%arg0: i32, %arg1: i32) -> (i32, i32) {
    %c0_i32 = arith.constant 0 : i32
    %c0_i32_0 = arith.constant 0 : i32
    %c0_i32_1 = arith.constant 0 : i32
    return %c0_i32, %c0_i32_0 : i32, i32
  }
  func.func @transform_3(%arg0: i32, %arg1: i32) -> (i32, i32) {
    %c0_i32 = arith.constant 0 : i32
    %c0_i32_0 = arith.constant 0 : i32
    %c0_i32_1 = arith.constant 0 : i32
    return %c0_i32, %c0_i32_0 : i32, i32
  }
  func.func @transform_4(%arg0: i32, %arg1: i32) -> (i32, i32, i32, i32) {
    %c0_i32 = arith.constant 0 : i32
    %c0_i32_0 = arith.constant 0 : i32
    %c0_i32_1 = arith.constant 0 : i32
    return %arg0, %arg1, %c0_i32, %c0_i32_0 : i32, i32, i32, i32
  }
}

</mosaic_0001>

<bundles_post_ra>
// kernel: conv_block_forward.2
= control target key start
LH: loop header
LB: loop body
LE: loop exit
PB: predicated region body
PF: predicated region fallthrough
CT: control target
= control target key end

     0   :  { %s3268_s9 = smov 0   ;;  %s3270_s10 = smov 0   ;;  %s3837_s0 = inlined_call_operand.vmem [shape: f32[2,18,18,4], index: 0, kind: input, shape index: {}]   ;;  %s3838_s1 = inlined_call_operand.vmem [shape: f32[9,4,8], index: 1, kind: input, shape index: {}]   ;;  %s3839_s2 = inlined_call_operand.vmem [shape: f32[2,2,8], index: 2, kind: output, shape index: {}]  }
   0x1   :  { %s3272_s11 = smov 0   ;;  %s3274_s12 = smov 0  }
   0x2   :  { %s3276_s13 = smov 0  }
   0x3 LB: > { %s21_s14 = sadd.s32 1, %s3242_s11  ;;  %s24_s15 = sadd.s32 1, %s3246_s12  ;;  %s3250_s13 = sphi %s3276_s13, %s12_s13   ;;  %s3246_s12 = sphi %s3274_s12, %s3843_s12   ;;  %s3242_s11 = sphi %s3272_s11, %s3842_s11   ;;  %s3238_s10 = sphi %s3270_s10, %s3841_s10   ;;  %s3234_s9 = sphi %s3268_s9, %s3840_s9  }
   0x4   : > { %p22_p0 = scmp.ge.s32.totalorder %s21_s14, 2  ;;  %p2384_p1 = scmp.ge.s32.totalorder %s3250_s13, 1 }
   0x5   : > { %p124_p2 = scmp.lt.s32.totalorder %s3250_s13, 5 }
   0x6   : > { %s3845_s14 = smov (%p22_p0, %s21_s14), 0  ;;  %s3847_s15 = smov (!%p22_p0, %s24_s15), %s3246_s12 }
   0x7   : > { %p125_p3 = pnand %p2384_p1, %p124_p2  ;;  %p26_p4 = scmp.ge.s32.totalorder %s3847_s15, 2 }
   0x8   : > { %p145_p5 = scmp.lt.s32.totalorder (!%p125_p3), %s3238_s10, 1  ;;  %p2387_p6 = scmp.ne.s32.totalorder (!%p125_p3), %s3234_s9, 0 }
   0x9   : > { %s3849_s15 = smov (%p26_p4, %s3847_s15), 0  ;;  %128 = sbr.rel (%p125_p3) target bundleno = 405 (0x195), region = 28 }
  0x10   : > { %s3851_s10 = smov (!%p145_p5, %s3238_s10), 1  ;;  %157 = sbr.rel (%p2387_p6) target bundleno = 23 (0x17), region = 32 }
  0x11   : > { %s3170_s16 = smul.u32 432, %s3851_s10  ;;  %s2386_s17 = sshll.u32 %s3851_s10, 1  ;;  %vm158_vm0 = vcmask (!%p2387_p6), 58368   ;;  %v3252_v0 = vmov (!%p2387_p6), 0.0  }
  0x12   : > { %s3303_s20 = scalar_lea.vmem %s3839_s2, %s2386_s17 }
  0x13   : > { %s149_s23 = scalar_lea.vmem %s3837_s0, %s3170_s16  ;;  %159 = vst.msk [vmem:[%s3303_s20] sm:$0x3] (!%p2387_p6), %vm158_vm0, %v3252_v0 }
  0x17 PF: > { %v2390_v1 = vld [vmem:[%s3838_s1 + $0x4] sm:$0xf]  ;;  %vm247_vm1 = vcmask 1043456   ;;  %v3316_v2 = vld [vmem:[%s3838_s1 + $0x10] sm:$0xf]  ;;  %s2389_s28 = smul.u32 192, %s3234_s9 }
  0x18   : > { %2806 = vmatprep.subr.msk.mxu1 %vm247_vm1, %v2390_v1  ;;  %2910 = vmatprep.subr.msk.mxu0 %vm247_vm1, %v3316_v2  ;;  %vm198_vm2 = vcmask 31744   ;;  %v179_v3 = vld [vmem:[%s3838_s1] sm:$0xf]  ;;  %v2529_v4 = vld [vmem:[%s3838_s1 + $0x14] sm:$0xf]  ;;  %vm2208_vm3 = vcmask 64512  }
  0x19   : > { %2807 = vmatpush3.msk.msra.mxu1 %vm247_vm1, %v2390_v1  ;;  %2911 = vmatpush3.msk.msra.mxu0 %vm247_vm1, %v3316_v2  ;;  %s3331_s5 = scalar_lea.vmem %s149_s23, %s2389_s28  ;;  %v2565_v10 = vld [vmem:[%s3838_s1 + $0x18] sm:$0xf]  ;;  %v3352_v11 = vld [vmem:[%s3838_s1 + $0x8] sm:$0xf]  ;;  %v3415_v21 = vld [vmem:[%s3838_s1 + $0x1c] sm:$0xf] }
  0x1a   : > { %v180_v5 = vld [vmem:[%s3331_s5 + $0x1] sm:$0xff]  ;;  %2832 = vmatprep.subr.msk.mxu1 %vm247_vm1, %v179_v3  ;;  %v2479_v6 = vld [vmem:[%s3331_s5 + $0x19] sm:$0xff]  ;;  %2936 = vmatprep.subr.msk.mxu0 %vm247_vm1, %v2529_v4  ;;  %v181_v7 = vld [vmem:[%s3331_s5 + $0x9] sm:$0xff]  ;;  %vm2301_vm4 = vcmask 57344  }
  0x1b   : > { %2808 = vmatprep.mubr.msk.f32.mxu1 %vm198_vm2, %v180_v5  ;;  %2912 = vmatprep.mubr.msk.f32.mxu0 %vm198_vm2, %v2479_v6  ;;  %v2480_v8 = vld [vmem:[%s3331_s5 + $0x21] sm:$0xff]  ;;  %v3342_v9 = vld [vmem:[%s3331_s5 + $0x31] sm:$0xff]  ;;  %v3357_v12 = vld [vmem:[%s3331_s5 + $0x39] sm:$0xff] }
  0x1c   : > { %2809 = vmatmul.mubr.msk.f32.vlgmr.msra.gmra.mrb[0].mxu1 %vm198_vm2, %v181_v7  ;;  %2913 = vmatmul.mubr.msk.f32.vlgmr.msra.gmra.mrb[0].mxu0 %vm198_vm2, %v2480_v8  ;;  %v3363_v13 = vld [vmem:[%s3331_s5 + $0x49] sm:$0xff]  ;;  %v3376_v14 = vld [vmem:[%s3331_s5 + $0x51] sm:$0xff]  ;;  %v3379_v15 = vld [vmem:[%s3331_s5 + $0x61] sm:$0xff] }
  0x1d   : > { %2833 = vmatpush3.msk.msra.mxu1 %vm247_vm1, %v179_v3  ;;  %2937 = vmatpush3.msk.msra.mxu0 %vm247_vm1, %v2529_v4  ;;  %v3390_v16 = vld [vmem:[%s3331_s5 + $0x69] sm:$0xff]  ;;  %v3393_v17 = vld [vmem:[%s3331_s5 + $0x1a] sm:$0xff]  ;;  %v3410_v20 = vld [vmem:[%s3331_s5 + $0x32] sm:$0xff] }
  0x1e   : > { %2811 = vmatprep.mubr.msk.f32.mxu1 %vm198_vm2, %v2479_v6  ;;  %2915 = vmatprep.mubr.msk.f32.mxu0 %vm198_vm2, %v3342_v9  ;;  %v3404_v18 = vld [vmem:[%s3331_s5 + $0x22] sm:$0xff]  ;;  %v3407_v19 = vld [vmem:[%s3331_s5 + $0x79] sm:$0xff]  ;;  %v3433_v24 = vld [vmem:[%s3331_s5 + $0x91] sm:$0xff] }
  0x1f   : > { %2962 = vmatprep.subr.msk.mxu0 %vm247_vm1, %v2565_v10  ;;  %2858 = vmatprep.subr.msk.mxu1 %vm247_vm1, %v3352_v11  ;;  %v3425_v22 = vld [vmem:[%s3331_s5 + $0x81] sm:$0xff]  ;;  %v3436_v25 = vld [vmem:[%s3331_s5 + $0x4a] sm:$0xff]  ;;  %v3449_v26 = vld [vmem:[%s3331_s5 + $0x99] sm:$0xff] }
  0x20   : > { %2812 = vmatmul.mubr.msk.f32.gmra.mrb[2].mxu1 %vm198_vm2, %v2480_v8  ;;  %2916 = vmatmul.mubr.msk.f32.gmra.mrb[2].mxu0 %vm198_vm2, %v3357_v12  ;;  %v3428_v23 = vld [vmem:[%s3331_s5 + $0x3a] sm:$0xff]  ;;  %v3452_v27 = vld [vmem:[%s3331_s5 + $0x52] sm:$0xff]  ;;  %v3455_v28 = vld [vmem:[%s3331_s5 + $0xa9] sm:$0xff] }
  0x21   : > { %2814 = vmatprep.mubr.msk.f32.mxu1 %vm198_vm2, %v3342_v9  ;;  %2918 = vmatprep.mubr.msk.f32.mxu0 %vm198_vm2, %v3363_v13  ;;  %v3458_v29 = vld [vmem:[%s3331_s5 + $0x62] sm:$0xff]  ;;  %v3469_v30 = vld [vmem:[%s3331_s5 + $0xb1] sm:$0xff]  ;;  %v3476_v33 = vld [vmem:[%s3331_s5 + $0x7a] sm:$0xff] }
  0x22   : > { %v3472_v31 = vld [vmem:[%s3331_s5 + $0x6a] sm:$0xff]  ;;  %v163_v32 = vld [vmem:[%s3331_s5] sm:$0xff]  ;;  %v3490_v36 = vld [vmem:[%s3331_s5 + $0x18] sm:$0xff] }
  0x23   : > { %v164_v34 = vld [vmem:[%s3331_s5 + $0x8] sm:$0xff]  ;;  %v3493_v37 = vld [vmem:[%s3331_s5 + $0x92] sm:$0xff]  ;;  %v3506_v39 = vld [vmem:[%s3331_s5 + $0x20] sm:$0xff] }
  0x24   : > { %2815 = vmatmul.mubr.msk.f32.gmra.mrb[4].mxu1 %vm198_vm2, %v3357_v12  ;;  %2919 = vmatmul.mubr.msk.f32.gmra.mrb[4].mxu0 %vm198_vm2, %v3376_v14  ;;  %v3487_v35 = vld [vmem:[%s3331_s5 + $0x82] sm:$0xff]  ;;  %v2461_v38 = vld [vmem:[%s3838_s1 + $0xc] sm:$0xf]  ;;  %v3509_v40 = vld [vmem:[%s3331_s5 + $0x9a] sm:$0xff] }
  0x25   : > { %2817 = vmatprep.mubr.msk.f32.mxu1 %vm198_vm2, %v3363_v13  ;;  %2921 = vmatprep.mubr.msk.f32.mxu0 %vm198_vm2, %v3379_v15  ;;  %v3514_v41 = vld [vmem:[%s3331_s5 + $0x30] sm:$0xff]  ;;  %v3529_v43 = vld [vmem:[%s3331_s5 + $0x38] sm:$0xff]  ;;  %v3535_v45 = vld [vmem:[%s3331_s5 + $0x48] sm:$0xff] }
  0x26   : > { %v3517_v42 = vld [vmem:[%s3331_s5 + $0xaa] sm:$0xff]  ;;  %v3532_v44 = vld [vmem:[%s3331_s5 + $0xb2] sm:$0xff]  ;;  %v3538_v46 = vld [vmem:[%s3331_s5 + $0xc2] sm:$0xff] }
  0x27   : > { %v3549_v47 = vld [vmem:[%s3331_s5 + $0x50] sm:$0xff]  ;;  %v3555_v49 = vld [vmem:[%s3331_s5 + $0x60] sm:$0xff]  ;;  %v3566_v50 = vld [vmem:[%s3331_s5 + $0x68] sm:$0xff] }
  0x28   : > { %2818 = vmatmul.mubr.msk.f32.gmra.mrb[6].mxu1 %vm198_vm2, %v3376_v14  ;;  %2922 = vmatmul.mubr.msk.f32.gmra.mrb[6].mxu0 %vm198_vm2, %v3390_v16  ;;  %v3552_v48 = vld [vmem:[%s3331_s5 + $0xca] sm:$0xff]  ;;  %v3569_v51 = vld [vmem:[%s3331_s5 + $0x78] sm:$0xff]  ;;  %v2633_v52 = vld [vmem:[%s3838_s1 + $0x20] sm:$0xf] }
  0x29   : > { %2820 = vmatprep.mubr.msk.f32.mxu1 %vm198_vm2, %v3379_v15  ;;  %2938 = vmatprep.mubr.msk.f32.mxu0 %vm198_vm2, %v3393_v17  ;;  %v3583_v53 = vld [vmem:[%s3331_s5 + $0x80] sm:$0xff]  ;;  %v3588_v54 = vld [vmem:[%s3331_s5 + $0x90] sm:$0xff]  ;;  %v3600_v55 = vld [vmem:[%s3331_s5 + $0x98] sm:$0xff] }
  0x2a   : > { %v3603_v56 = vld [vmem:[%s3331_s5 + $0xa8] sm:$0xff]  ;;  %v3614_v57 = vld [vmem:[%s3331_s5 + $0xb0] sm:$0xff]  ;;  %v3634_v60 = vld [vmem:[%s3331_s5 + $0xc0] sm:$0xff] }
  0x2b   : > { %v592_v58 = vld [vmem:[%s3331_s5 + $0x2] sm:$0xff]  ;;  %v593_v59 = vld [vmem:[%s3331_s5 + $0xa] sm:$0xff]  ;;  %v2563_v62 = vld [vmem:[%s3331_s5 + $0xd8] sm:$0xff] }
  0x2c   : > { %2821 = vmatmul.mubr.msk.f32.gmra.mrb[8].mxu1 %vm198_vm2, %v3390_v16  ;;  %2939 = vmatmul.mubr.msk.f32.vlgmr.msra.gmra.mrb[0].mxu0 %vm198_vm2, %v3404_v18  ;;  %v2562_v61 = vld [vmem:[%s3331_s5 + $0xc8] sm:$0xff]  ;;  %v2564_v63 = vld [vmem:[%s3331_s5 + $0xe0] sm:$0xff] }
  0x2d   : > { %2963 = vmatpush3.msk.msra.mxu0 %vm247_vm1, %v2565_v10  ;;  %2823 = vmatprep.mubr.msk.f32.mxu1 %vm198_vm2, %v3407_v19  ;;  %v2595_v0 = vld [vmem:[%s3331_s5 + $0xc1] sm:$0xff]  ;;  %v2596_v1 = vld [vmem:[%s3331_s5 + $0xc9] sm:$0xff] }
  0x2e   : > { %2941 = vmatprep.mubr.msk.f32.mxu0 %vm198_vm2, %v3410_v20  ;;  %2988 = vmatprep.subr.msk.mxu0 %vm247_vm1, %v3415_v21  ;;  %v2598_v3 = vld [vmem:[%s3331_s5 + $0xe1] sm:$0xff] }
  0x2f   : > { %v2631_v4 = vld [vmem:[%s3331_s5 + $0xda] sm:$0xff]  ;;  %v2632_v5 = vld [vmem:[%s3331_s5 + $0xe2] sm:$0xff] }
  0x30   : > { %2824 = vmatmul.mubr.msk.f32.gmra.mrb[10].mxu1 %vm198_vm2, %v3425_v22  ;;  %2942 = vmatmul.mubr.msk.f32.gmra.mrb[2].mxu0 %vm198_vm2, %v3428_v23 }
  0x31   : > { %2826 = vmatprep.mubr.msk.f32.mxu1 %vm198_vm2, %v3433_v24  ;;  %2944 = vmatprep.mubr.msk.f32.mxu0 %vm198_vm2, %v3436_v25 }
  0x34   : > { %2827 = vmatmul.mubr.msk.f32.gmra.mrb[12].mxu1 %vm198_vm2, %v3449_v26  ;;  %2945 = vmatmul.mubr.msk.f32.gmra.mrb[4].mxu0 %vm198_vm2, %v3452_v27 }
  0x35   : > { %2829 = vmatprep.mubr.msk.f32.mxu1 %vm198_vm2, %v3455_v28  ;;  %2947 = vmatprep.mubr.msk.f32.mxu0 %vm198_vm2, %v3458_v29 }
  0x38   : > { %2830 = vmatmul.mubr.msk.f32.gmra.mrb[14].mxu1 %vm198_vm2, %v3469_v30  ;;  %2948 = vmatmul.mubr.msk.f32.gmra.mrb[6].mxu0 %vm198_vm2, %v3472_v31 }
  0x39   : > { %2834 = vmatprep.mubr.msk.f32.mxu1 %vm198_vm2, %v163_v32  ;;  %2950 = vmatprep.mubr.msk.f32.mxu0 %vm198_vm2, %v3476_v33 }
  0x3c   : > { %2835 = vmatmul.mubr.msk.f32.vlgmr.msra.gmra.mrb[0].mxu1 %vm198_vm2, %v164_v34  ;;  %2951 = vmatmul.mubr.msk.f32.gmra.mrb[8].mxu0 %vm198_vm2, %v3487_v35 }
  0x3d   : > { %2859 = vmatpush3.msk.msra.mxu1 %vm247_vm1, %v3352_v11  ;;  %2837 = vmatprep.mubr.msk.f32.mxu1 %vm198_vm2, %v3490_v36 }
  0x3e   : > { %2953 = vmatprep.mubr.msk.f32.mxu0 %vm198_vm2, %v3493_v37  ;;  %2884 = vmatprep.subr.msk.mxu1 %vm247_vm1, %v2461_v38 }
  0x40   : > { %2838 = vmatmul.mubr.msk.f32.gmra.mrb[2].mxu1 %vm198_vm2, %v3506_v39  ;;  %2954 = vmatmul.mubr.msk.f32.gmra.mrb[10].mxu0 %vm198_vm2, %v3509_v40 }
  0x41   : > { %2840 = vmatprep.mubr.msk.f32.mxu1 %vm198_vm2, %v3514_v41  ;;  %2956 = vmatprep.mubr.msk.f32.mxu0 %vm198_vm2, %v3517_v42 }
  0x44   : > { %2841 = vmatmul.mubr.msk.f32.gmra.mrb[4].mxu1 %vm198_vm2, %v3529_v43  ;;  %2957 = vmatmul.mubr.msk.f32.gmra.mrb[12].mxu0 %vm198_vm2, %v3532_v44 }
  0x45   : > { %2843 = vmatprep.mubr.msk.f32.mxu1 %vm198_vm2, %v3535_v45  ;;  %2959 = vmatprep.mubr.msk.f32.mxu0 %vm198_vm2, %v3538_v46 }
  0x48   : > { %2844 = vmatmul.mubr.msk.f32.gmra.mrb[6].mxu1 %vm198_vm2, %v3549_v47  ;;  %2960 = vmatmul.mubr.msk.f32.gmra.mrb[14].mxu0 %vm198_vm2, %v3552_v48 }
  0x49   : > { %2846 = vmatprep.mubr.msk.f32.mxu1 %vm198_vm2, %v3555_v49  ;;  %2964 = vmatprep.mubr.msk.f32.mxu0 %vm198_vm2, %v3514_v41 }
  0x4c   : > { %2847 = vmatmul.mubr.msk.f32.gmra.mrb[8].mxu1 %vm198_vm2, %v3566_v50  ;;  %2965 = vmatmul.mubr.msk.f32.vlgmr.msra.gmra.mrb[0].mxu0 %vm198_vm2, %v3529_v43 }
  0x4d   : > { %2989 = vmatpush3.msk.msra.mxu0 %vm247_vm1, %v3415_v21  ;;  %2849 = vmatprep.mubr.msk.f32.mxu1 %vm198_vm2, %v3569_v51 }
  0x4e   : > { %2967 = vmatprep.mubr.msk.f32.mxu0 %vm198_vm2, %v3535_v45  ;;  %3014 = vmatprep.subr.msk.mxu0 %vm247_vm1, %v2633_v52 }
  0x50   : > { %2850 = vmatmul.mubr.msk.f32.gmra.mrb[10].mxu1 %vm198_vm2, %v3583_v53  ;;  %2968 = vmatmul.mubr.msk.f32.gmra.mrb[2].mxu0 %vm198_vm2, %v3549_v47 }
  0x51   : > { %2852 = vmatprep.mubr.msk.f32.mxu1 %vm198_vm2, %v3588_v54  ;;  %2970 = vmatprep.mubr.msk.f32.mxu0 %vm198_vm2, %v3555_v49 }
  0x54   : > { %2853 = vmatmul.mubr.msk.f32.gmra.mrb[12].mxu1 %vm198_vm2, %v3600_v55  ;;  %2971 = vmatmul.mubr.msk.f32.gmra.mrb[4].mxu0 %vm198_vm2, %v3566_v50 }
  0x55   : > { %2855 = vmatprep.mubr.msk.f32.mxu1 %vm198_vm2, %v3603_v56  ;;  %2973 = vmatprep.mubr.msk.f32.mxu0 %vm198_vm2, %v3569_v51 }
  0x58   : > { %2856 = vmatmul.mubr.msk.f32.gmra.mrb[14].mxu1 %vm198_vm2, %v3614_v57  ;;  %2974 = vmatmul.mubr.msk.f32.gmra.mrb[6].mxu0 %vm198_vm2, %v3583_v53 }
  0x59   : > { %2860 = vmatprep.mubr.msk.f32.mxu1 %vm198_vm2, %v592_v58  ;;  %2976 = vmatprep.mubr.msk.f32.mxu0 %vm198_vm2, %v3588_v54 }
  0x5c   : > { %2861 = vmatmul.mubr.msk.f32.vlgmr.msra.gmra.mrb[0].mxu1 %vm198_vm2, %v593_v59  ;;  %2977 = vmatmul.mubr.msk.f32.gmra.mrb[8].mxu0 %vm198_vm2, %v3600_v55 }
  0x5d   : > { %2885 = vmatpush3.msk.msra.mxu1 %vm247_vm1, %v2461_v38  ;;  %2863 = vmatprep.mubr.msk.f32.mxu1 %vm198_vm2, %v3393_v17 }
  0x5e   : > { %2979 = vmatprep.mubr.msk.f32.mxu0 %vm198_vm2, %v3603_v56  ;;  %3040 = vmatprep.subr.msk.mxu1 %vm247_vm1, %v3316_v2 }
  0x60   : > { %2864 = vmatmul.mubr.msk.f32.gmra.mrb[2].mxu1 %vm198_vm2, %v3404_v18  ;;  %2980 = vmatmul.mubr.msk.f32.gmra.mrb[10].mxu0 %vm198_vm2, %v3614_v57 }
  0x61   : > { %2866 = vmatprep.mubr.msk.f32.mxu1 %vm198_vm2, %v3410_v20  ;;  %2982 = vmatprep.mubr.msk.f32.mxu0 %vm198_vm2, %v3634_v60 }
  0x64   : > { %2867 = vmatmul.mubr.msk.f32.gmra.mrb[4].mxu1 %vm198_vm2, %v3428_v23  ;;  %2983 = vmatmul.mubr.msk.f32.gmra.mrb[12].mxu0 %vm198_vm2, %v2562_v61 }
  0x65   : > { %2869 = vmatprep.mubr.msk.f32.mxu1 %vm198_vm2, %v3436_v25  ;;  %2985 = vmatprep.mubr.msk.f32.mxu0 %vm198_vm2, %v2563_v62 }
  0x68   : > { %2870 = vmatmul.mubr.msk.f32.gmra.mrb[6].mxu1 %vm198_vm2, %v3452_v27  ;;  %2986 = vmatmul.mubr.msk.f32.gmra.mrb[14].mxu0 %vm198_vm2, %v2564_v63 }
  0x69   : > { %2872 = vmatprep.mubr.msk.f32.mxu1 %vm198_vm2, %v3458_v29  ;;  %2990 = vmatprep.mubr.msk.f32.mxu0 %vm198_vm2, %v3342_v9 }
  0x6c   : > { %2873 = vmatmul.mubr.msk.f32.gmra.mrb[8].mxu1 %vm198_vm2, %v3472_v31  ;;  %2991 = vmatmul.mubr.msk.f32.vlgmr.msra.gmra.mrb[0].mxu0 %vm198_vm2, %v3357_v12 }
  0x6d   : > { %3015 = vmatpush3.msk.msra.mxu0 %vm247_vm1, %v2633_v52  ;;  %2875 = vmatprep.mubr.msk.f32.mxu1 %vm198_vm2, %v3476_v33 }
  0x6e   : > { %2993 = vmatprep.mubr.msk.f32.mxu0 %vm198_vm2, %v3363_v13 }
  0x70   : > { %2876 = vmatmul.mubr.msk.f32.gmra.mrb[10].mxu1 %vm198_vm2, %v3487_v35  ;;  %2994 = vmatmul.mubr.msk.f32.gmra.mrb[2].mxu0 %vm198_vm2, %v3376_v14 }
  0x71   : > { %2878 = vmatprep.mubr.msk.f32.mxu1 %vm198_vm2, %v3493_v37  ;;  %2996 = vmatprep.mubr.msk.f32.mxu0 %vm198_vm2, %v3379_v15 }
  0x74   : > { %2879 = vmatmul.mubr.msk.f32.gmra.mrb[12].mxu1 %vm198_vm2, %v3509_v40  ;;  %2997 = vmatmul.mubr.msk.f32.gmra.mrb[4].mxu0 %vm198_vm2, %v3390_v16 }
  0x75   : > { %2881 = vmatprep.mubr.msk.f32.mxu1 %vm198_vm2, %v3517_v42  ;;  %2999 = vmatprep.mubr.msk.f32.mxu0 %vm198_vm2, %v3407_v19 }
  0x78   : > { %2882 = vmatmul.mubr.msk.f32.gmra.mrb[14].mxu1 %vm198_vm2, %v3532_v44  ;;  %3000 = vmatmul.mubr.msk.f32.gmra.mrb[6].mxu0 %vm198_vm2, %v3425_v22 }
  0x79   : > { %2886 = vmatprep.mubr.msk.f32.mxu1 %vm198_vm2, %v3490_v36  ;;  %3002 = vmatprep.mubr.msk.f32.mxu0 %vm198_vm2, %v3433_v24 }
  0x7c   : > { %2887 = vmatmul.mubr.msk.f32.vlgmr.msra.gmra.mrb[0].mxu1 %vm198_vm2, %v3506_v39  ;;  %3003 = vmatmul.mubr.msk.f32.gmra.mrb[8].mxu0 %vm198_vm2, %v3449_v26 }
  0x7d   : > { %3041 = vmatpush3.msk.msra.mxu1 %vm247_vm1, %v3316_v2  ;;  %2889 = vmatprep.mubr.msk.f32.mxu1 %vm198_vm2, %v3514_v41  ;;  %v2597_v2 = vld [vmem:[%s3331_s5 + $0xd9] sm:$0xff] }
  0x7e   : > { %3005 = vmatprep.mubr.msk.f32.mxu0 %vm198_vm2, %v3455_v28 }
  0x80   : > { %2890 = vmatmul.mubr.msk.f32.gmra.mrb[2].mxu1 %vm198_vm2, %v3529_v43  ;;  %3006 = vmatmul.mubr.msk.f32.gmra.mrb[10].mxu0 %vm198_vm2, %v3469_v30 }
  0x81   : > { %2892 = vmatprep.mubr.msk.f32.mxu1 %vm198_vm2, %v3535_v45  ;;  %3008 = vmatprep.mubr.msk.f32.mxu0 %vm198_vm2, %v2595_v0 }
  0x84   : > { %2893 = vmatmul.mubr.msk.f32.gmra.mrb[4].mxu1 %vm198_vm2, %v3549_v47  ;;  %3009 = vmatmul.mubr.msk.f32.gmra.mrb[12].mxu0 %vm198_vm2, %v2596_v1 }
  0x85   : > { %2895 = vmatprep.mubr.msk.f32.mxu1 %vm198_vm2, %v3555_v49  ;;  %3011 = vmatprep.mubr.msk.f32.mxu0 %vm198_vm2, %v2597_v2 }
  0x88   : > { %2896 = vmatmul.mubr.msk.f32.gmra.mrb[6].mxu1 %vm198_vm2, %v3566_v50  ;;  %3012 = vmatmul.mubr.msk.f32.gmra.mrb[14].mxu0 %vm198_vm2, %v2598_v3 }
  0x89   : > { %2898 = vmatprep.mubr.msk.f32.mxu1 %vm198_vm2, %v3569_v51  ;;  %3016 = vmatprep.mubr.msk.f32.mxu0 %vm198_vm2, %v3410_v20 }
  0x8c   : > { %2899 = vmatmul.mubr.msk.f32.gmra.mrb[8].mxu1 %vm198_vm2, %v3583_v53  ;;  %3017 = vmatmul.mubr.msk.f32.vlgmr.msra.gmra.mrb[0].mxu0 %vm198_vm2, %v3428_v23 }
  0x8d   : > { %2901 = vmatprep.mubr.msk.f32.mxu1 %vm198_vm2, %v3588_v54  ;;  %3019 = vmatprep.mubr.msk.f32.mxu0 %vm198_vm2, %v3436_v25 }
  0x90   : > { %2902 = vmatmul.mubr.msk.f32.gmra.mrb[10].mxu1 %vm198_vm2, %v3600_v55  ;;  %3020 = vmatmul.mubr.msk.f32.gmra.mrb[2].mxu0 %vm198_vm2, %v3452_v27 }
  0x91   : > { %2904 = vmatprep.mubr.msk.f32.mxu1 %vm198_vm2, %v3603_v56  ;;  %3022 = vmatprep.mubr.msk.f32.mxu0 %vm198_vm2, %v3458_v29 }
  0x94   : > { %2905 = vmatmul.mubr.msk.f32.gmra.mrb[12].mxu1 %vm198_vm2, %v3614_v57  ;;  %3023 = vmatmul.mubr.msk.f32.gmra.mrb[4].mxu0 %vm198_vm2, %v3472_v31 }
  0x95   : > { %2907 = vmatprep.mubr.msk.f32.mxu1 %vm198_vm2, %v3634_v60  ;;  %3025 = vmatprep.mubr.msk.f32.mxu0 %vm198_vm2, %v3476_v33 }
  0x98   : > { %2908 = vmatmul.mubr.msk.f32.gmra.mrb[14].mxu1 %vm198_vm2, %v2562_v61  ;;  %3026 = vmatmul.mubr.msk.f32.gmra.mrb[6].mxu0 %vm198_vm2, %v3487_v35 }
  0x99   : > { %2924 = vmatprep.mubr.msk.f32.mxu1 %vm198_vm2, %v3407_v19  ;;  %3028 = vmatprep.mubr.msk.f32.mxu0 %vm198_vm2, %v3493_v37 }
  0x9c   : > { %2925 = vmatmul.mubr.msk.f32.vlgmr.msra.gmra.mrb[8].mxu1 %vm198_vm2, %v3425_v22  ;;  %3029 = vmatmul.mubr.msk.f32.gmra.mrb[8].mxu0 %vm198_vm2, %v3509_v40 }
  0x9d   : > { %2927 = vmatprep.mubr.msk.f32.mxu1 %vm198_vm2, %v3433_v24  ;;  %3031 = vmatprep.mubr.msk.f32.mxu0 %vm198_vm2, %v3517_v42 }
  0xa0   : > { %2928 = vmatmul.mubr.msk.f32.gmra.mrb[10].mxu1 %vm198_vm2, %v3449_v26  ;;  %3032 = vmatmul.mubr.msk.f32.gmra.mrb[10].mxu0 %vm198_vm2, %v3532_v44 }
  0xa1   : > { %2930 = vmatprep.mubr.msk.f32.mxu1 %vm198_vm2, %v3455_v28  ;;  %3034 = vmatprep.mubr.msk.f32.mxu0 %vm198_vm2, %v3538_v46 }
  0xa4   : > { %2931 = vmatmul.mubr.msk.f32.gmra.mrb[12].mxu1 %vm198_vm2, %v3469_v30  ;;  %3035 = vmatmul.mubr.msk.f32.gmra.mrb[12].mxu0 %vm198_vm2, %v3552_v48 }
  0xa5   : > { %2933 = vmatprep.mubr.msk.f32.mxu1 %vm198_vm2, %v2595_v0  ;;  %3037 = vmatprep.mubr.msk.f32.mxu0 %vm198_vm2, %v2631_v4 }
  0xa8   : > { %2934 = vmatmul.mubr.msk.f32.gmra.mrb[14].mxu1 %vm198_vm2, %v2596_v1  ;;  %3038 = vmatmul.mubr.msk.f32.gmra.mrb[14].mxu0 %vm198_vm2, %v2632_v5 }
 0x14f   : > { %v2888_v6 = vpop.f32.mrb[0].mxu1 }
 0x150   : > { %v960_v7 = vpop.f32.mrb[1].mxu1 }
 0x153   : > { %v2891_v8 = vpop.f32.mrb[2].mxu1 }
 0x154   : > { %v970_v9 = vpop.f32.mrb[3].mxu1 }
 0x157   : > { %v2894_v10 = vpop.f32.mrb[4].mxu1 }
 0x158   : > { %v980_v11 = vpop.f32.mrb[5].mxu1 }
 0x15b   : > { %v2897_v12 = vpop.f32.mrb[6].mxu1 }
 0x15c   : > { %v990_v13 = vpop.f32.mrb[7].mxu1 }
 0x15f   : > { %v3018_v14 = vpop.f32.mrb[0].mxu0 }
 0x160   : > { %v3042_v15 = vadd.f32 %v3018_v14, %v2888_v6  ;;  %v2113_v16 = vpop.f32.mrb[1].mxu0 }
 0x161   : > { %v3043_v17 = vadd.f32 %v2113_v16, %v960_v7 }
 0x162   : > { %v2210_v18 = vsel %vm2208_vm3, %v3042_v15, 0.0  ;;  %v2247_v19 = vmul.f32 %v3042_v15, %v3042_v15 }
 0x163   : > { %v2209_v20 = vsel %vm2208_vm3, %v3043_v17, 0.0  ;;  %v2246_v21 = vmul.f32 %v3043_v17, %v3043_v17  ;;  %v3021_v22 = vpop.f32.mrb[2].mxu0 }
 0x164   : > { %v2263_v23 = vsel %vm2208_vm3, %v2247_v19, 0.0  ;;  %v2211_v24 = vadd.f32 %v2210_v18, %v2209_v20  ;;  %v3044_v25 = vadd.f32 %v3021_v22, %v2891_v8  ;;  %v2123_v26 = vpop.f32.mrb[3].mxu0 }
 0x165   : > { %v2262_v27 = vsel %vm2208_vm3, %v2246_v21, 0.0  ;;  %v3045_v28 = vadd.f32 %v2123_v26, %v970_v9 }
 0x166   : > { %v2264_v29 = vadd.f32 %v2263_v23, %v2262_v27  ;;  %v2249_v30 = vmul.f32 %v3044_v25, %v3044_v25  ;;  %v2214_v37 = vsel %vm2208_vm3, %v3044_v25, 0.0 }
 0x167   : > { %v2212_v31 = vsel %vm2208_vm3, %v3045_v28, 0.0  ;;  %v2248_v32 = vmul.f32 %v3045_v28, %v3045_v28  ;;  %v3024_v33 = vpop.f32.mrb[4].mxu0 }
 0x168   : > { %v2213_v34 = vadd.f32 %v2212_v31, %v2211_v24  ;;  %v3046_v35 = vadd.f32 %v3024_v33, %v2894_v10  ;;  %v2133_v36 = vpop.f32.mrb[5].mxu0  ;;  %v2267_v42 = vsel %vm2208_vm3, %v2249_v30, 0.0 }
 0x169   : > { %v2265_v38 = vsel %vm2208_vm3, %v2248_v32, 0.0  ;;  %v3047_v39 = vadd.f32 %v2133_v36, %v980_v11 }
 0x16a   : > { %v2266_v40 = vadd.f32 %v2265_v38, %v2264_v29  ;;  %v2215_v41 = vadd.f32 %v2214_v37, %v2213_v34  ;;  %v2251_v43 = vmul.f32 %v3046_v35, %v3046_v35  ;;  %v2218_v51 = vsel %vm2208_vm3, %v3046_v35, 0.0 }
 0x16b   : > { %v2216_v44 = vsel %vm2208_vm3, %v3047_v39, 0.0  ;;  %v2250_v45 = vmul.f32 %v3047_v39, %v3047_v39  ;;  %v3027_v46 = vpop.f32.mrb[6].mxu0 }
 0x16c   : > { %v2217_v47 = vadd.f32 %v2216_v44, %v2215_v41  ;;  %v2268_v48 = vadd.f32 %v2267_v42, %v2266_v40  ;;  %v3048_v49 = vadd.f32 %v3027_v46, %v2897_v12  ;;  %v2143_v50 = vpop.f32.mrb[7].mxu0  ;;  %v2271_v56 = vsel %vm2208_vm3, %v2251_v43, 0.0 }
 0x16d   : > { %v2269_v52 = vsel %vm2208_vm3, %v2250_v45, 0.0  ;;  %v3049_v53 = vadd.f32 %v2143_v50, %v990_v13 }
 0x16e   : > { %v2270_v54 = vadd.f32 %v2269_v52, %v2268_v48  ;;  %v2219_v55 = vadd.f32 %v2218_v51, %v2217_v47  ;;  %v2253_v57 = vmul.f32 %v3048_v49, %v3048_v49  ;;  %v2222_v3 = vsel %vm2208_vm3, %v3048_v49, 0.0 }
 0x16f   : > { %v2220_v58 = vsel %vm2208_vm3, %v3049_v53, 0.0  ;;  %v2252_v59 = vmul.f32 %v3049_v53, %v3049_v53  ;;  %v2926_v60 = vpop.f32.mrb[8].mxu1  ;;  %v3030_v61 = vpop.f32.mrb[8].mxu0 }
 0x170   : > { %v2221_v62 = vadd.f32 %v2220_v58, %v2219_v55  ;;  %v2272_v63 = vadd.f32 %v2271_v56, %v2270_v54  ;;  %v3050_v0 = vadd.f32 %v3030_v61, %v2926_v60  ;;  %v1230_v1 = vpop.f32.mrb[9].mxu1  ;;  %v2153_v2 = vpop.f32.mrb[9].mxu0  ;;  %v2275_v8 = vsel %vm2208_vm3, %v2253_v57, 0.0 }
 0x171   : > { %v2273_v4 = vsel %vm2208_vm3, %v2252_v59, 0.0  ;;  %v3051_v5 = vadd.f32 %v2153_v2, %v1230_v1 }
 0x172   : > { %v2274_v6 = vadd.f32 %v2273_v4, %v2272_v63  ;;  %v2223_v7 = vadd.f32 %v2222_v3, %v2221_v62  ;;  %v2255_v9 = vmul.f32 %v3050_v0, %v3050_v0  ;;  %v2226_v19 = vsel %vm2208_vm3, %v3050_v0, 0.0 }
 0x173   : > { %v2224_v10 = vsel %vm2208_vm3, %v3051_v5, 0.0  ;;  %v2254_v11 = vmul.f32 %v3051_v5, %v3051_v5  ;;  %v2929_v12 = vpop.f32.mrb[10].mxu1  ;;  %v3033_v13 = vpop.f32.mrb[10].mxu0 }
 0x174   : > { %v2225_v14 = vadd.f32 %v2224_v10, %v2223_v7  ;;  %v2276_v15 = vadd.f32 %v2275_v8, %v2274_v6  ;;  %v3052_v16 = vadd.f32 %v3033_v13, %v2929_v12  ;;  %v1240_v17 = vpop.f32.mrb[11].mxu1  ;;  %v2163_v18 = vpop.f32.mrb[11].mxu0  ;;  %v2279_v24 = vsel %vm2208_vm3, %v2255_v9, 0.0  ;;  %v2299_v13 = vld [vmem:[%s3303_s20] sm:$0x1] }
 0x175   : > { %v2277_v20 = vsel %vm2208_vm3, %v2254_v11, 0.0  ;;  %v3053_v21 = vadd.f32 %v2163_v18, %v1240_v17 }
 0x176   : > { %v2278_v22 = vadd.f32 %v2277_v20, %v2276_v15  ;;  %v2227_v23 = vadd.f32 %v2226_v19, %v2225_v14  ;;  %v2257_v25 = vmul.f32 %v3052_v16, %v3052_v16  ;;  %v2230_v35 = vsel %vm2208_vm3, %v3052_v16, 0.0  ;;  %v2303_v16 = vld [vmem:[%s3303_s20 + $0x1] sm:$0x1] }
 0x177   : > { %v2228_v26 = vsel %vm2208_vm3, %v3053_v21, 0.0  ;;  %v2256_v27 = vmul.f32 %v3053_v21, %v3053_v21  ;;  %v2932_v28 = vpop.f32.mrb[12].mxu1  ;;  %v3036_v29 = vpop.f32.mrb[12].mxu0 }
 0x178   : > { %v2229_v30 = vadd.f32 %v2228_v26, %v2227_v23  ;;  %v2280_v31 = vadd.f32 %v2279_v24, %v2278_v22  ;;  %v3054_v32 = vadd.f32 %v3036_v29, %v2932_v28  ;;  %v1250_v33 = vpop.f32.mrb[13].mxu1  ;;  %v2173_v34 = vpop.f32.mrb[13].mxu0  ;;  %v2283_v40 = vsel %vm2208_vm3, %v2257_v25, 0.0 }
 0x179   : > { %v2281_v36 = vsel %vm2208_vm3, %v2256_v27, 0.0  ;;  %v3055_v37 = vadd.f32 %v2173_v34, %v1250_v33 }
 0x17a   : > { %v2282_v38 = vadd.f32 %v2281_v36, %v2280_v31  ;;  %v2231_v39 = vadd.f32 %v2230_v35, %v2229_v30  ;;  %v2259_v41 = vmul.f32 %v3054_v32, %v3054_v32  ;;  %v2234_v51 = vsel %vm2208_vm3, %v3054_v32, 0.0 }
 0x17b   : > { %v2232_v42 = vsel %vm2208_vm3, %v3055_v37, 0.0  ;;  %v2258_v43 = vmul.f32 %v3055_v37, %v3055_v37  ;;  %v2935_v44 = vpop.f32.mrb[14].mxu1  ;;  %v3039_v45 = vpop.f32.mrb[14].mxu0 }
 0x17c   : > { %v2233_v46 = vadd.f32 %v2232_v42, %v2231_v39  ;;  %v2284_v47 = vadd.f32 %v2283_v40, %v2282_v38  ;;  %v3056_v48 = vadd.f32 %v3039_v45, %v2935_v44  ;;  %v1260_v49 = vpop.f32.mrb[15].mxu1  ;;  %v2183_v50 = vpop.f32.mrb[15].mxu0  ;;  %v2287_v56 = vsel %vm2208_vm3, %v2259_v41, 0.0 }
 0x17d   : > { %v2285_v52 = vsel %vm2208_vm3, %v2258_v43, 0.0  ;;  %v3057_v53 = vadd.f32 %v2183_v50, %v1260_v49 }
 0x17e   : > { %v2286_v54 = vadd.f32 %v2285_v52, %v2284_v47  ;;  %v2235_v55 = vadd.f32 %v2234_v51, %v2233_v46  ;;  %v2261_v57 = vmul.f32 %v3056_v48, %v3056_v48  ;;  %v2238_v62 = vsel %vm2208_vm3, %v3056_v48, 0.0 }
 0x17f   : > { %v2236_v58 = vsel %vm2208_vm3, %v3057_v53, 0.0  ;;  %v2260_v59 = vmul.f32 %v3057_v53, %v3057_v53 }
 0x180   : > { %v2237_v60 = vadd.f32 %v2236_v58, %v2235_v55  ;;  %v2288_v61 = vadd.f32 %v2287_v56, %v2286_v54  ;;  %v2291_v2 = vsel %vm2208_vm3, %v2261_v57, 0.0 }
 0x181   : > { %v2289_v63 = vsel %vm2208_vm3, %v2260_v59, 0.0 }
 0x182   : > { %v2239_v0 = vadd.f32 %v2238_v62, %v2237_v60  ;;  %v2290_v1 = vadd.f32 %v2289_v63, %v2288_v61 }
 0x184   : > { %v2240_v3 = vrot.slane %v2239_v0, 4  ;;  %v2292_v4 = vadd.f32 %v2291_v2, %v2290_v1 }
 0x186   : > { %v2241_v5 = vadd.f32 %v2240_v3, %v2239_v0  ;;  %v2293_v6 = vrot.slane %v2292_v4, 4 }
 0x188   : > { %v2242_v7 = vrot.slane %v2241_v5, 2  ;;  %v2294_v8 = vadd.f32 %v2293_v6, %v2292_v4 }
 0x18a   : > { %v2243_v9 = vadd.f32 %v2242_v7, %v2241_v5  ;;  %v2295_v10 = vrot.slane %v2294_v8, 2 }
 0x18c   : > { %v2244_v11 = vrot.slane %v2243_v9, 1  ;;  %v2296_v12 = vadd.f32 %v2295_v10, %v2294_v8 }
 0x18e   : > { %v2245_v14 = vadd.f32 %v2244_v11, %v2243_v9  ;;  %v2297_v15 = vrot.slane %v2296_v12, 1 }
 0x190   : > { %v2298_v17 = vadd.f32 %v2297_v15, %v2296_v12  ;;  %v2300_v18 = vadd.f32 %v2299_v13, %v2245_v14 }
 0x192   : > { %2302 = vst.msk [vmem:[%s3303_s20] sm:$0x1] %vm2301_vm4, %v2300_v18  ;;  %v2304_v19 = vadd.f32 %v2303_v16, %v2298_v17 }
 0x194   : > { %2305 = vst.msk [vmem:[%s3303_s20 + $0x1] sm:$0x1] %vm2301_vm4, %v2304_v19 }
 0x195 PF: > { %s12_s13 = sadd.s32 1, %s3250_s13   ;;  %s3840_s9 = smov %s3242_s11 }
 0x196   : > { %p9_p7 = scmp.ge.s32.totalorder %s12_s13, 6   ;;  %s3841_s10 = smov %s3246_s12 }
 0x197   : > { %s3842_s11 = smov %s3845_s14  ;;  %s3843_s12 = smov %s3849_s15 }
 0x198   :  { %11 = sbr.rel (!%p9_p7) target bundleno = 3 (0x3), region = 73 }

// kernel: conv_block_forward.3
= control target key start
LH: loop header
LB: loop body
LE: loop exit
PB: predicated region body
PF: predicated region fallthrough
CT: control target
= control target key end

     0   :  { %s3382_s15 = smov 0   ;;  %s3384_s16 = smov 0   ;;  %s3992_s0 = inlined_call_operand.vmem [shape: f32[2,18,18,4], index: 0, kind: input, shape index: {}]   ;;  %s3993_s1 = inlined_call_operand.vmem [shape: f32[9,4,8], index: 1, kind: input, shape index: {}]   ;;  %s3994_s2 = inlined_call_operand.vmem [shape: f32[1,8], index: 2, kind: input, shape index: {}]   ;;  %s3995_s3 = inlined_call_operand.vmem [shape: f32[1,8], index: 3, kind: input, shape index: {}]   ;;  %s3996_s4 = inlined_call_operand.vmem [shape: f32[2,16,16,8], index: 4, kind: output, shape index: {}]  }
   0x1   :  { %s3386_s17 = smov 0   ;;  %s3388_s18 = smov 0  }
   0x2   :  { %s3390_s19 = smov 0  }
   0x3 LB: > { %s23_s20 = sadd.s32 1, %s3347_s17  ;;  %s26_s21 = sadd.s32 1, %s3351_s18  ;;  %s3355_s19 = sphi %s3390_s19, %s14_s19   ;;  %s3351_s18 = sphi %s3388_s18, %s4000_s18   ;;  %s3347_s17 = sphi %s3386_s17, %s3999_s17   ;;  %s3343_s16 = sphi %s3384_s16, %s3998_s16   ;;  %s3339_s15 = sphi %s3382_s15, %s3997_s15  }
   0x4   : > { %p24_p0 = scmp.ge.s32.totalorder %s23_s20, 2  ;;  %p2486_p1 = scmp.ge.s32.totalorder %s3355_s19, 1 }
   0x5   : > { %p176_p2 = scmp.lt.s32.totalorder %s3355_s19, 5 }
   0x6   : > { %s4002_s20 = smov (%p24_p0, %s23_s20), 0  ;;  %s4004_s21 = smov (!%p24_p0, %s26_s21), %s3351_s18 }
   0x7   : > { %p177_p3 = pnand %p2486_p1, %p176_p2  ;;  %p28_p4 = scmp.ge.s32.totalorder %s4004_s21, 2 }
   0x8   : > { %v2494_v0 = vld [vmem:[%s3993_s1 + $0x4] sm:$0xf] (!%p177_p3)  ;;  %vm310_vm0 = vcmask (!%p177_p3), 1043456   ;;  %v3420_v1 = vld [vmem:[%s3993_s1 + $0x10] sm:$0xf] (!%p177_p3)  ;;  %p207_p5 = scmp.lt.s32.totalorder (!%p177_p3), %s3343_s16, 1 }
   0x9   : > { %s4006_s21 = smov (%p28_p4, %s4004_s21), 0  ;;  %180 = sbr.rel (%p177_p3) target bundleno = 386 (0x182), region = 36 }
   0xa   : > { %2912 = vmatprep.subr.msk.mxu1 (!%p177_p3), %vm310_vm0, %v2494_v0  ;;  %3016 = vmatprep.subr.msk.mxu0 (!%p177_p3), %vm310_vm0, %v3420_v1  ;;  %v242_v2 = vld [vmem:[%s3993_s1] sm:$0xf] (!%p177_p3)  ;;  %v2633_v3 = vld [vmem:[%s3993_s1 + $0x14] sm:$0xf] (!%p177_p3)  ;;  %s2493_s30 = smul.u32 (!%p177_p3), 192, %s3339_s15  ;;  %vm261_vm1 = vcmask (!%p177_p3), 31744  }
   0xb   : > { %2913 = vmatpush3.msk.msra.mxu1 (!%p177_p3), %vm310_vm0, %v2494_v0  ;;  %3017 = vmatpush3.msk.msra.mxu0 (!%p177_p3), %vm310_vm0, %v3420_v1  ;;  %v2669_v9 = vld [vmem:[%s3993_s1 + $0x18] sm:$0xf] (!%p177_p3)  ;;  %v3462_v10 = vld [vmem:[%s3993_s1 + $0x8] sm:$0xf] (!%p177_p3)  ;;  %v3525_v20 = vld [vmem:[%s3993_s1 + $0x1c] sm:$0xf] (!%p177_p3) }
   0xc   : > { %2938 = vmatprep.subr.msk.mxu1 (!%p177_p3), %vm310_vm0, %v242_v2  ;;  %3042 = vmatprep.subr.msk.mxu0 (!%p177_p3), %vm310_vm0, %v2633_v3  ;;  %v2565_v37 = vld [vmem:[%s3993_s1 + $0xc] sm:$0xf] (!%p177_p3)  ;;  %v2737_v51 = vld [vmem:[%s3993_s1 + $0x20] sm:$0xf] (!%p177_p3)  ;;  %s2488_s27 = sshll.u32 (!%p177_p3), %s3339_s15, 3  ;;  %vm2365_vm3 = vcmask (!%p177_p3), 64512  }
   0xd   : > { %p215_p6 = scmp.lt.s32.totalorder (!%p177_p3), %s2488_s27, 15 }
  0x10   : > { %s4008_s16 = smov (!%p207_p5, %s3343_s16), 1  ;;  %s4010_s27 = smov (!%p215_p6, %s2488_s27), 15 }
  0x11   : > { %s3276_s5 = smul.u32 432, %s4008_s16  ;;  %s2489_s28 = sshll.u32 %s4010_s27, 1 }
  0x12   : > { %s2490_s29 = sshll.u32 %s4008_s16, 5 }
  0x13   : > { %s211_s8 = scalar_lea.vmem %s3992_s0, %s3276_s5  ;;  %s219_s6 = sadd.s32 %s2490_s29, %s2489_s28 }
  0x14   : > { %s3443_s9 = scalar_lea.vmem %s211_s8, %s2493_s30  ;;  %s2491_s8 = sshll.u32 %s219_s6, 3 }
  0x15   : > { %v243_v4 = vld [vmem:[%s3443_s9 + $0x1] sm:$0xff]  ;;  %v2583_v5 = vld [vmem:[%s3443_s9 + $0x19] sm:$0xff]  ;;  %v244_v6 = vld [vmem:[%s3443_s9 + $0x9] sm:$0xff]  ;;  %s3915_s10 = scalar_lea.vmem %s3996_s4, %s2491_s8 }
  0x16   : > { %2914 = vmatprep.mubr.msk.f32.mxu1 %vm261_vm1, %v243_v4  ;;  %3018 = vmatprep.mubr.msk.f32.mxu0 %vm261_vm1, %v2583_v5  ;;  %v2584_v7 = vld [vmem:[%s3443_s9 + $0x21] sm:$0xff]  ;;  %v3452_v8 = vld [vmem:[%s3443_s9 + $0x31] sm:$0xff]  ;;  %v3467_v11 = vld [vmem:[%s3443_s9 + $0x39] sm:$0xff] }
  0x17   : > { %2915 = vmatmul.mubr.msk.f32.vlgmr.msra.gmra.mrb[0].mxu1 %vm261_vm1, %v244_v6  ;;  %3019 = vmatmul.mubr.msk.f32.vlgmr.msra.gmra.mrb[0].mxu0 %vm261_vm1, %v2584_v7  ;;  %v3473_v12 = vld [vmem:[%s3443_s9 + $0x49] sm:$0xff]  ;;  %v3486_v13 = vld [vmem:[%s3443_s9 + $0x51] sm:$0xff]  ;;  %v3489_v14 = vld [vmem:[%s3443_s9 + $0x61] sm:$0xff] }
  0x18   : > { %2939 = vmatpush3.msk.msra.mxu1 %vm310_vm0, %v242_v2  ;;  %3043 = vmatpush3.msk.msra.mxu0 %vm310_vm0, %v2633_v3  ;;  %v3500_v15 = vld [vmem:[%s3443_s9 + $0x69] sm:$0xff]  ;;  %v3503_v16 = vld [vmem:[%s3443_s9 + $0x1a] sm:$0xff]  ;;  %v3520_v19 = vld [vmem:[%s3443_s9 + $0x32] sm:$0xff] }
  0x19   : > { %2917 = vmatprep.mubr.msk.f32.mxu1 %vm261_vm1, %v2583_v5  ;;  %3021 = vmatprep.mubr.msk.f32.mxu0 %vm261_vm1, %v3452_v8  ;;  %v3514_v17 = vld [vmem:[%s3443_s9 + $0x22] sm:$0xff]  ;;  %v3517_v18 = vld [vmem:[%s3443_s9 + $0x79] sm:$0xff]  ;;  %v3543_v23 = vld [vmem:[%s3443_s9 + $0x91] sm:$0xff] }
  0x1a   : > { %3068 = vmatprep.subr.msk.mxu0 %vm310_vm0, %v2669_v9  ;;  %2964 = vmatprep.subr.msk.mxu1 %vm310_vm0, %v3462_v10  ;;  %v3535_v21 = vld [vmem:[%s3443_s9 + $0x81] sm:$0xff]  ;;  %v3546_v24 = vld [vmem:[%s3443_s9 + $0x4a] sm:$0xff]  ;;  %v3559_v25 = vld [vmem:[%s3443_s9 + $0x99] sm:$0xff] }
  0x1b   : > { %2918 = vmatmul.mubr.msk.f32.gmra.mrb[2].mxu1 %vm261_vm1, %v2584_v7  ;;  %3022 = vmatmul.mubr.msk.f32.gmra.mrb[2].mxu0 %vm261_vm1, %v3467_v11  ;;  %v3538_v22 = vld [vmem:[%s3443_s9 + $0x3a] sm:$0xff]  ;;  %v3562_v26 = vld [vmem:[%s3443_s9 + $0x52] sm:$0xff]  ;;  %v3565_v27 = vld [vmem:[%s3443_s9 + $0xa9] sm:$0xff] }
  0x1c   : > { %2920 = vmatprep.mubr.msk.f32.mxu1 %vm261_vm1, %v3452_v8  ;;  %3024 = vmatprep.mubr.msk.f32.mxu0 %vm261_vm1, %v3473_v12  ;;  %v3568_v28 = vld [vmem:[%s3443_s9 + $0x62] sm:$0xff]  ;;  %v3579_v29 = vld [vmem:[%s3443_s9 + $0xb1] sm:$0xff]  ;;  %v3586_v32 = vld [vmem:[%s3443_s9 + $0x7a] sm:$0xff] }
  0x1d   : > { %v3582_v30 = vld [vmem:[%s3443_s9 + $0x6a] sm:$0xff]  ;;  %v226_v31 = vld [vmem:[%s3443_s9] sm:$0xff]  ;;  %v3600_v35 = vld [vmem:[%s3443_s9 + $0x18] sm:$0xff] }
  0x1e   : > { %v227_v33 = vld [vmem:[%s3443_s9 + $0x8] sm:$0xff]  ;;  %v3603_v36 = vld [vmem:[%s3443_s9 + $0x92] sm:$0xff]  ;;  %v3616_v38 = vld [vmem:[%s3443_s9 + $0x20] sm:$0xff] }
  0x1f   : > { %2921 = vmatmul.mubr.msk.f32.gmra.mrb[4].mxu1 %vm261_vm1, %v3467_v11  ;;  %3025 = vmatmul.mubr.msk.f32.gmra.mrb[4].mxu0 %vm261_vm1, %v3486_v13  ;;  %v3597_v34 = vld [vmem:[%s3443_s9 + $0x82] sm:$0xff]  ;;  %v3619_v39 = vld [vmem:[%s3443_s9 + $0x9a] sm:$0xff]  ;;  %v3624_v40 = vld [vmem:[%s3443_s9 + $0x30] sm:$0xff] }
  0x20   : > { %2923 = vmatprep.mubr.msk.f32.mxu1 %vm261_vm1, %v3473_v12  ;;  %3027 = vmatprep.mubr.msk.f32.mxu0 %vm261_vm1, %v3489_v14  ;;  %v3627_v41 = vld [vmem:[%s3443_s9 + $0xaa] sm:$0xff]  ;;  %v3639_v42 = vld [vmem:[%s3443_s9 + $0x38] sm:$0xff]  ;;  %v3648_v45 = vld [vmem:[%s3443_s9 + $0xc2] sm:$0xff] }
  0x21   : > { %v3642_v43 = vld [vmem:[%s3443_s9 + $0xb2] sm:$0xff]  ;;  %v3645_v44 = vld [vmem:[%s3443_s9 + $0x48] sm:$0xff]  ;;  %v3665_v48 = vld [vmem:[%s3443_s9 + $0x60] sm:$0xff] }
  0x22   : > { %v3659_v46 = vld [vmem:[%s3443_s9 + $0x50] sm:$0xff]  ;;  %v3676_v49 = vld [vmem:[%s3443_s9 + $0x68] sm:$0xff]  ;;  %v3679_v50 = vld [vmem:[%s3443_s9 + $0x78] sm:$0xff] }
  0x23   : > { %2924 = vmatmul.mubr.msk.f32.gmra.mrb[6].mxu1 %vm261_vm1, %v3486_v13  ;;  %3028 = vmatmul.mubr.msk.f32.gmra.mrb[6].mxu0 %vm261_vm1, %v3500_v15  ;;  %v3662_v47 = vld [vmem:[%s3443_s9 + $0xca] sm:$0xff]  ;;  %v3693_v52 = vld [vmem:[%s3443_s9 + $0x80] sm:$0xff]  ;;  %v3710_v54 = vld [vmem:[%s3443_s9 + $0x98] sm:$0xff] }
  0x24   : > { %2926 = vmatprep.mubr.msk.f32.mxu1 %vm261_vm1, %v3489_v14  ;;  %3044 = vmatprep.mubr.msk.f32.mxu0 %vm261_vm1, %v3503_v16  ;;  %v3698_v53 = vld [vmem:[%s3443_s9 + $0x90] sm:$0xff]  ;;  %v3713_v55 = vld [vmem:[%s3443_s9 + $0xa8] sm:$0xff]  ;;  %v3744_v59 = vld [vmem:[%s3443_s9 + $0xc0] sm:$0xff] }
  0x25   : > { %v3724_v56 = vld [vmem:[%s3443_s9 + $0xb0] sm:$0xff]  ;;  %v655_v57 = vld [vmem:[%s3443_s9 + $0x2] sm:$0xff]  ;;  %v2667_v61 = vld [vmem:[%s3443_s9 + $0xd8] sm:$0xff] }
  0x26   : > { %v656_v58 = vld [vmem:[%s3443_s9 + $0xa] sm:$0xff]  ;;  %v2668_v62 = vld [vmem:[%s3443_s9 + $0xe0] sm:$0xff] }
  0x27   : > { %2927 = vmatmul.mubr.msk.f32.gmra.mrb[8].mxu1 %vm261_vm1, %v3500_v15  ;;  %3045 = vmatmul.mubr.msk.f32.vlgmr.msra.gmra.mrb[0].mxu0 %vm261_vm1, %v3514_v17  ;;  %v2666_v60 = vld [vmem:[%s3443_s9 + $0xc8] sm:$0xff]  ;;  %v2735_v3 = vld [vmem:[%s3443_s9 + $0xda] sm:$0xff] }
  0x28   : > { %3069 = vmatpush3.msk.msra.mxu0 %vm310_vm0, %v2669_v9  ;;  %2929 = vmatprep.mubr.msk.f32.mxu1 %vm261_vm1, %v3517_v18  ;;  %v2699_v63 = vld [vmem:[%s3443_s9 + $0xc1] sm:$0xff]  ;;  %v2700_v0 = vld [vmem:[%s3443_s9 + $0xc9] sm:$0xff] }
  0x29   : > { %3047 = vmatprep.mubr.msk.f32.mxu0 %vm261_vm1, %v3520_v19  ;;  %3094 = vmatprep.subr.msk.mxu0 %vm310_vm0, %v3525_v20  ;;  %v2702_v2 = vld [vmem:[%s3443_s9 + $0xe1] sm:$0xff] }
  0x2a   : > { %v2736_v4 = vld [vmem:[%s3443_s9 + $0xe2] sm:$0xff] }
  0x2b   : > { %2930 = vmatmul.mubr.msk.f32.gmra.mrb[10].mxu1 %vm261_vm1, %v3535_v21  ;;  %3048 = vmatmul.mubr.msk.f32.gmra.mrb[2].mxu0 %vm261_vm1, %v3538_v22 }
  0x2c   : > { %2932 = vmatprep.mubr.msk.f32.mxu1 %vm261_vm1, %v3543_v23  ;;  %3050 = vmatprep.mubr.msk.f32.mxu0 %vm261_vm1, %v3546_v24 }
  0x2f   : > { %2933 = vmatmul.mubr.msk.f32.gmra.mrb[12].mxu1 %vm261_vm1, %v3559_v25  ;;  %3051 = vmatmul.mubr.msk.f32.gmra.mrb[4].mxu0 %vm261_vm1, %v3562_v26 }
  0x30   : > { %2935 = vmatprep.mubr.msk.f32.mxu1 %vm261_vm1, %v3565_v27  ;;  %3053 = vmatprep.mubr.msk.f32.mxu0 %vm261_vm1, %v3568_v28 }
  0x33   : > { %2936 = vmatmul.mubr.msk.f32.gmra.mrb[14].mxu1 %vm261_vm1, %v3579_v29  ;;  %3054 = vmatmul.mubr.msk.f32.gmra.mrb[6].mxu0 %vm261_vm1, %v3582_v30 }
  0x34   : > { %2940 = vmatprep.mubr.msk.f32.mxu1 %vm261_vm1, %v226_v31  ;;  %3056 = vmatprep.mubr.msk.f32.mxu0 %vm261_vm1, %v3586_v32 }
  0x37   : > { %2941 = vmatmul.mubr.msk.f32.vlgmr.msra.gmra.mrb[0].mxu1 %vm261_vm1, %v227_v33  ;;  %3057 = vmatmul.mubr.msk.f32.gmra.mrb[8].mxu0 %vm261_vm1, %v3597_v34 }
  0x38   : > { %2965 = vmatpush3.msk.msra.mxu1 %vm310_vm0, %v3462_v10  ;;  %2943 = vmatprep.mubr.msk.f32.mxu1 %vm261_vm1, %v3600_v35 }
  0x39   : > { %3059 = vmatprep.mubr.msk.f32.mxu0 %vm261_vm1, %v3603_v36  ;;  %2990 = vmatprep.subr.msk.mxu1 %vm310_vm0, %v2565_v37 }
  0x3b   : > { %2944 = vmatmul.mubr.msk.f32.gmra.mrb[2].mxu1 %vm261_vm1, %v3616_v38  ;;  %3060 = vmatmul.mubr.msk.f32.gmra.mrb[10].mxu0 %vm261_vm1, %v3619_v39 }
  0x3c   : > { %2946 = vmatprep.mubr.msk.f32.mxu1 %vm261_vm1, %v3624_v40  ;;  %3062 = vmatprep.mubr.msk.f32.mxu0 %vm261_vm1, %v3627_v41 }
  0x3f   : > { %2947 = vmatmul.mubr.msk.f32.gmra.mrb[4].mxu1 %vm261_vm1, %v3639_v42  ;;  %3063 = vmatmul.mubr.msk.f32.gmra.mrb[12].mxu0 %vm261_vm1, %v3642_v43 }
  0x40   : > { %2949 = vmatprep.mubr.msk.f32.mxu1 %vm261_vm1, %v3645_v44  ;;  %3065 = vmatprep.mubr.msk.f32.mxu0 %vm261_vm1, %v3648_v45 }
  0x43   : > { %2950 = vmatmul.mubr.msk.f32.gmra.mrb[6].mxu1 %vm261_vm1, %v3659_v46  ;;  %3066 = vmatmul.mubr.msk.f32.gmra.mrb[14].mxu0 %vm261_vm1, %v3662_v47 }
  0x44   : > { %2952 = vmatprep.mubr.msk.f32.mxu1 %vm261_vm1, %v3665_v48  ;;  %3070 = vmatprep.mubr.msk.f32.mxu0 %vm261_vm1, %v3624_v40 }
  0x47   : > { %2953 = vmatmul.mubr.msk.f32.gmra.mrb[8].mxu1 %vm261_vm1, %v3676_v49  ;;  %3071 = vmatmul.mubr.msk.f32.vlgmr.msra.gmra.mrb[0].mxu0 %vm261_vm1, %v3639_v42 }
  0x48   : > { %3095 = vmatpush3.msk.msra.mxu0 %vm310_vm0, %v3525_v20  ;;  %2955 = vmatprep.mubr.msk.f32.mxu1 %vm261_vm1, %v3679_v50 }
  0x49   : > { %3073 = vmatprep.mubr.msk.f32.mxu0 %vm261_vm1, %v3645_v44  ;;  %3120 = vmatprep.subr.msk.mxu0 %vm310_vm0, %v2737_v51 }
  0x4b   : > { %2956 = vmatmul.mubr.msk.f32.gmra.mrb[10].mxu1 %vm261_vm1, %v3693_v52  ;;  %3074 = vmatmul.mubr.msk.f32.gmra.mrb[2].mxu0 %vm261_vm1, %v3659_v46 }
  0x4c   : > { %2958 = vmatprep.mubr.msk.f32.mxu1 %vm261_vm1, %v3698_v53  ;;  %3076 = vmatprep.mubr.msk.f32.mxu0 %vm261_vm1, %v3665_v48 }
  0x4f   : > { %2959 = vmatmul.mubr.msk.f32.gmra.mrb[12].mxu1 %vm261_vm1, %v3710_v54  ;;  %3077 = vmatmul.mubr.msk.f32.gmra.mrb[4].mxu0 %vm261_vm1, %v3676_v49 }
  0x50   : > { %2961 = vmatprep.mubr.msk.f32.mxu1 %vm261_vm1, %v3713_v55  ;;  %3079 = vmatprep.mubr.msk.f32.mxu0 %vm261_vm1, %v3679_v50 }
  0x53   : > { %2962 = vmatmul.mubr.msk.f32.gmra.mrb[14].mxu1 %vm261_vm1, %v3724_v56  ;;  %3080 = vmatmul.mubr.msk.f32.gmra.mrb[6].mxu0 %vm261_vm1, %v3693_v52 }
  0x54   : > { %2966 = vmatprep.mubr.msk.f32.mxu1 %vm261_vm1, %v655_v57  ;;  %3082 = vmatprep.mubr.msk.f32.mxu0 %vm261_vm1, %v3698_v53 }
  0x57   : > { %2967 = vmatmul.mubr.msk.f32.vlgmr.msra.gmra.mrb[0].mxu1 %vm261_vm1, %v656_v58  ;;  %3083 = vmatmul.mubr.msk.f32.gmra.mrb[8].mxu0 %vm261_vm1, %v3710_v54 }
  0x58   : > { %2991 = vmatpush3.msk.msra.mxu1 %vm310_vm0, %v2565_v37  ;;  %2969 = vmatprep.mubr.msk.f32.mxu1 %vm261_vm1, %v3503_v16 }
  0x59   : > { %3085 = vmatprep.mubr.msk.f32.mxu0 %vm261_vm1, %v3713_v55  ;;  %3146 = vmatprep.subr.msk.mxu1 %vm310_vm0, %v3420_v1 }
  0x5b   : > { %2970 = vmatmul.mubr.msk.f32.gmra.mrb[2].mxu1 %vm261_vm1, %v3514_v17  ;;  %3086 = vmatmul.mubr.msk.f32.gmra.mrb[10].mxu0 %vm261_vm1, %v3724_v56  ;;  %v3906_v17 = vld [vmem:[%s3995_s3] ss:$0 sm:$0xff] }
  0x5c   : > { %2972 = vmatprep.mubr.msk.f32.mxu1 %vm261_vm1, %v3520_v19  ;;  %3088 = vmatprep.mubr.msk.f32.mxu0 %vm261_vm1, %v3744_v59 }
  0x5f   : > { %2973 = vmatmul.mubr.msk.f32.gmra.mrb[4].mxu1 %vm261_vm1, %v3538_v22  ;;  %3089 = vmatmul.mubr.msk.f32.gmra.mrb[12].mxu0 %vm261_vm1, %v2666_v60 }
  0x60   : > { %2975 = vmatprep.mubr.msk.f32.mxu1 %vm261_vm1, %v3546_v24  ;;  %3091 = vmatprep.mubr.msk.f32.mxu0 %vm261_vm1, %v2667_v61 }
  0x63   : > { %2976 = vmatmul.mubr.msk.f32.gmra.mrb[6].mxu1 %vm261_vm1, %v3562_v26  ;;  %3092 = vmatmul.mubr.msk.f32.gmra.mrb[14].mxu0 %vm261_vm1, %v2668_v62 }
  0x64   : > { %2978 = vmatprep.mubr.msk.f32.mxu1 %vm261_vm1, %v3568_v28  ;;  %3096 = vmatprep.mubr.msk.f32.mxu0 %vm261_vm1, %v3452_v8 }
  0x67   : > { %2979 = vmatmul.mubr.msk.f32.gmra.mrb[8].mxu1 %vm261_vm1, %v3582_v30  ;;  %3097 = vmatmul.mubr.msk.f32.vlgmr.msra.gmra.mrb[0].mxu0 %vm261_vm1, %v3467_v11 }
  0x68   : > { %3121 = vmatpush3.msk.msra.mxu0 %vm310_vm0, %v2737_v51  ;;  %2981 = vmatprep.mubr.msk.f32.mxu1 %vm261_vm1, %v3586_v32 }
  0x69   : > { %3099 = vmatprep.mubr.msk.f32.mxu0 %vm261_vm1, %v3473_v12 }
  0x6b   : > { %2982 = vmatmul.mubr.msk.f32.gmra.mrb[10].mxu1 %vm261_vm1, %v3597_v34  ;;  %3100 = vmatmul.mubr.msk.f32.gmra.mrb[2].mxu0 %vm261_vm1, %v3486_v13 }
  0x6c   : > { %2984 = vmatprep.mubr.msk.f32.mxu1 %vm261_vm1, %v3603_v36  ;;  %3102 = vmatprep.mubr.msk.f32.mxu0 %vm261_vm1, %v3489_v14  ;;  %v3901_v14 = vld [vmem:[%s3994_s2] ss:$0 sm:$0xff] }
  0x6f   : > { %2985 = vmatmul.mubr.msk.f32.gmra.mrb[12].mxu1 %vm261_vm1, %v3619_v39  ;;  %3103 = vmatmul.mubr.msk.f32.gmra.mrb[4].mxu0 %vm261_vm1, %v3500_v15 }
  0x70   : > { %2987 = vmatprep.mubr.msk.f32.mxu1 %vm261_vm1, %v3627_v41  ;;  %3105 = vmatprep.mubr.msk.f32.mxu0 %vm261_vm1, %v3517_v18 }
  0x73   : > { %2988 = vmatmul.mubr.msk.f32.gmra.mrb[14].mxu1 %vm261_vm1, %v3642_v43  ;;  %3106 = vmatmul.mubr.msk.f32.gmra.mrb[6].mxu0 %vm261_vm1, %v3535_v21 }
  0x74   : > { %2992 = vmatprep.mubr.msk.f32.mxu1 %vm261_vm1, %v3600_v35  ;;  %3108 = vmatprep.mubr.msk.f32.mxu0 %vm261_vm1, %v3543_v23 }
  0x77   : > { %2993 = vmatmul.mubr.msk.f32.vlgmr.msra.gmra.mrb[0].mxu1 %vm261_vm1, %v3616_v38  ;;  %3109 = vmatmul.mubr.msk.f32.gmra.mrb[8].mxu0 %vm261_vm1, %v3559_v25 }
  0x78   : > { %3147 = vmatpush3.msk.msra.mxu1 %vm310_vm0, %v3420_v1  ;;  %2995 = vmatprep.mubr.msk.f32.mxu1 %vm261_vm1, %v3624_v40  ;;  %v2701_v1 = vld [vmem:[%s3443_s9 + $0xd9] sm:$0xff] }
  0x79   : > { %3111 = vmatprep.mubr.msk.f32.mxu0 %vm261_vm1, %v3565_v27 }
  0x7b   : > { %2996 = vmatmul.mubr.msk.f32.gmra.mrb[2].mxu1 %vm261_vm1, %v3639_v42  ;;  %3112 = vmatmul.mubr.msk.f32.gmra.mrb[10].mxu0 %vm261_vm1, %v3579_v29 }
  0x7c   : > { %2998 = vmatprep.mubr.msk.f32.mxu1 %vm261_vm1, %v3645_v44  ;;  %3114 = vmatprep.mubr.msk.f32.mxu0 %vm261_vm1, %v2699_v63 }
  0x7f   : > { %2999 = vmatmul.mubr.msk.f32.gmra.mrb[4].mxu1 %vm261_vm1, %v3659_v46  ;;  %3115 = vmatmul.mubr.msk.f32.gmra.mrb[12].mxu0 %vm261_vm1, %v2700_v0 }
  0x80   : > { %3001 = vmatprep.mubr.msk.f32.mxu1 %vm261_vm1, %v3665_v48  ;;  %3117 = vmatprep.mubr.msk.f32.mxu0 %vm261_vm1, %v2701_v1 }
  0x83   : > { %3002 = vmatmul.mubr.msk.f32.gmra.mrb[6].mxu1 %vm261_vm1, %v3676_v49  ;;  %3118 = vmatmul.mubr.msk.f32.gmra.mrb[14].mxu0 %vm261_vm1, %v2702_v2 }
  0x84   : > { %3004 = vmatprep.mubr.msk.f32.mxu1 %vm261_vm1, %v3679_v50  ;;  %3122 = vmatprep.mubr.msk.f32.mxu0 %vm261_vm1, %v3520_v19 }
  0x87   : > { %3005 = vmatmul.mubr.msk.f32.gmra.mrb[8].mxu1 %vm261_vm1, %v3693_v52  ;;  %3123 = vmatmul.mubr.msk.f32.vlgmr.msra.gmra.mrb[0].mxu0 %vm261_vm1, %v3538_v22 }
  0x88   : > { %3007 = vmatprep.mubr.msk.f32.mxu1 %vm261_vm1, %v3698_v53  ;;  %3125 = vmatprep.mubr.msk.f32.mxu0 %vm261_vm1, %v3546_v24 }
  0x8b   : > { %3008 = vmatmul.mubr.msk.f32.gmra.mrb[10].mxu1 %vm261_vm1, %v3710_v54  ;;  %3126 = vmatmul.mubr.msk.f32.gmra.mrb[2].mxu0 %vm261_vm1, %v3562_v26 }
  0x8c   : > { %3010 = vmatprep.mubr.msk.f32.mxu1 %vm261_vm1, %v3713_v55  ;;  %3128 = vmatprep.mubr.msk.f32.mxu0 %vm261_vm1, %v3568_v28 }
  0x8f   : > { %3011 = vmatmul.mubr.msk.f32.gmra.mrb[12].mxu1 %vm261_vm1, %v3724_v56  ;;  %3129 = vmatmul.mubr.msk.f32.gmra.mrb[4].mxu0 %vm261_vm1, %v3582_v30 }
  0x90   : > { %3013 = vmatprep.mubr.msk.f32.mxu1 %vm261_vm1, %v3744_v59  ;;  %3131 = vmatprep.mubr.msk.f32.mxu0 %vm261_vm1, %v3586_v32 }
  0x93   : > { %3014 = vmatmul.mubr.msk.f32.gmra.mrb[14].mxu1 %vm261_vm1, %v2666_v60  ;;  %3132 = vmatmul.mubr.msk.f32.gmra.mrb[6].mxu0 %vm261_vm1, %v3597_v34 }
  0x94   : > { %3030 = vmatprep.mubr.msk.f32.mxu1 %vm261_vm1, %v3517_v18  ;;  %3134 = vmatprep.mubr.msk.f32.mxu0 %vm261_vm1, %v3603_v36 }
  0x97   : > { %3031 = vmatmul.mubr.msk.f32.vlgmr.msra.gmra.mrb[8].mxu1 %vm261_vm1, %v3535_v21  ;;  %3135 = vmatmul.mubr.msk.f32.gmra.mrb[8].mxu0 %vm261_vm1, %v3619_v39 }
  0x98   : > { %3033 = vmatprep.mubr.msk.f32.mxu1 %vm261_vm1, %v3543_v23  ;;  %3137 = vmatprep.mubr.msk.f32.mxu0 %vm261_vm1, %v3627_v41 }
  0x9b   : > { %3034 = vmatmul.mubr.msk.f32.gmra.mrb[10].mxu1 %vm261_vm1, %v3559_v25  ;;  %3138 = vmatmul.mubr.msk.f32.gmra.mrb[10].mxu0 %vm261_vm1, %v3642_v43 }
  0x9c   : > { %3036 = vmatprep.mubr.msk.f32.mxu1 %vm261_vm1, %v3565_v27  ;;  %3140 = vmatprep.mubr.msk.f32.mxu0 %vm261_vm1, %v3648_v45 }
  0x9f   : > { %3037 = vmatmul.mubr.msk.f32.gmra.mrb[12].mxu1 %vm261_vm1, %v3579_v29  ;;  %3141 = vmatmul.mubr.msk.f32.gmra.mrb[12].mxu0 %vm261_vm1, %v3662_v47 }
  0xa0   : > { %3039 = vmatprep.mubr.msk.f32.mxu1 %vm261_vm1, %v2699_v63  ;;  %3143 = vmatprep.mubr.msk.f32.mxu0 %vm261_vm1, %v2735_v3 }
  0xa3   : > { %3040 = vmatmul.mubr.msk.f32.gmra.mrb[14].mxu1 %vm261_vm1, %v2700_v0  ;;  %3144 = vmatmul.mubr.msk.f32.gmra.mrb[14].mxu0 %vm261_vm1, %v2736_v4 }
 0x14a   : > { %v2994_v5 = vpop.f32.mrb[0].mxu1 }
 0x14b   : > { %v1023_v6 = vpop.f32.mrb[1].mxu1 }
 0x14e   : > { %v2997_v7 = vpop.f32.mrb[2].mxu1 }
 0x14f   : > { %v1033_v8 = vpop.f32.mrb[3].mxu1 }
 0x152   : > { %v3000_v9 = vpop.f32.mrb[4].mxu1 }
 0x153   : > { %v1043_v10 = vpop.f32.mrb[5].mxu1 }
 0x156   : > { %v3003_v11 = vpop.f32.mrb[6].mxu1 }
 0x157   : > { %v1053_v12 = vpop.f32.mrb[7].mxu1 }
 0x15a   : > { %v3124_v13 = vpop.f32.mrb[0].mxu0 }
 0x15b   : > { %v3148_v15 = vadd.f32 %v3124_v13, %v2994_v5  ;;  %v2176_v16 = vpop.f32.mrb[1].mxu0 }
 0x15c   : > { %v3149_v18 = vadd.f32 %v2176_v16, %v1023_v6 }
 0x15d   : > { %v2279_v19 = vmul.f32 %v3148_v15, %v3901_v14 }
 0x15e   : > { %v2278_v20 = vmul.f32 %v3149_v18, %v3901_v14  ;;  %v3127_v21 = vpop.f32.mrb[2].mxu0 }
 0x15f   : > { %v2302_v22 = vadd.f32 %v3906_v17, %v2279_v19  ;;  %v3150_v23 = vadd.f32 %v3127_v21, %v2997_v7  ;;  %v2186_v24 = vpop.f32.mrb[3].mxu0 }
 0x160   : > { %v2301_v25 = vadd.f32 %v3906_v17, %v2278_v20  ;;  %v3151_v26 = vadd.f32 %v2186_v24, %v1033_v8 }
 0x161   : > { %vm2318_vm2 = vcmp.gt.f32.partialorder %v2302_v22, 0.0  ;;  %v2334_v27 = vmul.f32 0.1, %v2302_v22  ;;  %v2281_v28 = vmul.f32 %v3150_v23, %v3901_v14 }
 0x162   : > { %vm2317_vm4 = vcmp.gt.f32.partialorder %v2301_v25, 0.0  ;;  %v2333_v29 = vmul.f32 0.1, %v2301_v25  ;;  %v2280_v30 = vmul.f32 %v3151_v26, %v3901_v14  ;;  %v3130_v31 = vpop.f32.mrb[4].mxu0 }
 0x163   : > { %v2350_v32 = vsel %vm2318_vm2, %v2302_v22, %v2334_v27  ;;  %v2304_v33 = vadd.f32 %v3906_v17, %v2281_v28  ;;  %v3152_v34 = vadd.f32 %v3130_v31, %v3000_v9  ;;  %v2196_v35 = vpop.f32.mrb[5].mxu0 }
 0x164   : > { %2367 = vst.msk [vmem:[%s3915_s10 + $0x8] sm:$0xff] %vm2365_vm3, %v2350_v32  ;;  %v2349_v36 = vsel %vm2317_vm4, %v2301_v25, %v2333_v29  ;;  %v2303_v37 = vadd.f32 %v3906_v17, %v2280_v30  ;;  %v3153_v38 = vadd.f32 %v2196_v35, %v1043_v10 }
 0x165   : > { %2366 = vst.msk [vmem:[%s3915_s10] sm:$0xff] %vm2365_vm3, %v2349_v36  ;;  %vm2320_vm5 = vcmp.gt.f32.partialorder %v2304_v33, 0.0  ;;  %v2336_v39 = vmul.f32 0.1, %v2304_v33  ;;  %v2283_v40 = vmul.f32 %v3152_v34, %v3901_v14 }
 0x166   : > { %vm2319_vm6 = vcmp.gt.f32.partialorder %v2303_v37, 0.0  ;;  %v2335_v41 = vmul.f32 0.1, %v2303_v37  ;;  %v2282_v42 = vmul.f32 %v3153_v38, %v3901_v14  ;;  %v3133_v43 = vpop.f32.mrb[6].mxu0 }
 0x167   : > { %v2352_v44 = vsel %vm2320_vm5, %v2304_v33, %v2336_v39  ;;  %v2306_v45 = vadd.f32 %v3906_v17, %v2283_v40  ;;  %v3154_v46 = vadd.f32 %v3133_v43, %v3003_v11  ;;  %v2206_v47 = vpop.f32.mrb[7].mxu0 }
 0x168   : > { %2369 = vst.msk [vmem:[%s3915_s10 + $0x18] sm:$0xff] %vm2365_vm3, %v2352_v44  ;;  %v2351_v48 = vsel %vm2319_vm6, %v2303_v37, %v2335_v41  ;;  %v2305_v49 = vadd.f32 %v3906_v17, %v2282_v42  ;;  %v3155_v50 = vadd.f32 %v2206_v47, %v1053_v12 }
 0x169   : > { %2368 = vst.msk [vmem:[%s3915_s10 + $0x10] sm:$0xff] %vm2365_vm3, %v2351_v48  ;;  %vm2322_vm7 = vcmp.gt.f32.partialorder %v2306_v45, 0.0  ;;  %v2338_v51 = vmul.f32 0.1, %v2306_v45  ;;  %v2285_v52 = vmul.f32 %v3154_v46, %v3901_v14 }
 0x16a   : > { %vm2321_vm8 = vcmp.gt.f32.partialorder %v2305_v49, 0.0  ;;  %v2337_v53 = vmul.f32 0.1, %v2305_v49  ;;  %v2284_v54 = vmul.f32 %v3155_v50, %v3901_v14  ;;  %v3032_v55 = vpop.f32.mrb[8].mxu1  ;;  %v3136_v56 = vpop.f32.mrb[8].mxu0 }
 0x16b   : > { %v2354_v57 = vsel %vm2322_vm7, %v2306_v45, %v2338_v51  ;;  %v2308_v58 = vadd.f32 %v3906_v17, %v2285_v52  ;;  %v3156_v59 = vadd.f32 %v3136_v56, %v3032_v55  ;;  %v1293_v60 = vpop.f32.mrb[9].mxu1  ;;  %v2216_v61 = vpop.f32.mrb[9].mxu0 }
 0x16c   : > { %2371 = vst.msk [vmem:[%s3915_s10 + $0x28] sm:$0xff] %vm2365_vm3, %v2354_v57  ;;  %v2353_v62 = vsel %vm2321_vm8, %v2305_v49, %v2337_v53  ;;  %v2307_v63 = vadd.f32 %v3906_v17, %v2284_v54  ;;  %v3157_v0 = vadd.f32 %v2216_v61, %v1293_v60 }
 0x16d   : > { %2370 = vst.msk [vmem:[%s3915_s10 + $0x20] sm:$0xff] %vm2365_vm3, %v2353_v62  ;;  %vm2324_vm9 = vcmp.gt.f32.partialorder %v2308_v58, 0.0  ;;  %v2340_v1 = vmul.f32 0.1, %v2308_v58  ;;  %v2287_v2 = vmul.f32 %v3156_v59, %v3901_v14 }
 0x16e   : > { %vm2323_vm10 = vcmp.gt.f32.partialorder %v2307_v63, 0.0  ;;  %v2339_v3 = vmul.f32 0.1, %v2307_v63  ;;  %v2286_v4 = vmul.f32 %v3157_v0, %v3901_v14  ;;  %v3035_v5 = vpop.f32.mrb[10].mxu1  ;;  %v3139_v6 = vpop.f32.mrb[10].mxu0 }
 0x16f   : > { %v2356_v7 = vsel %vm2324_vm9, %v2308_v58, %v2340_v1  ;;  %v2310_v8 = vadd.f32 %v3906_v17, %v2287_v2  ;;  %v3158_v9 = vadd.f32 %v3139_v6, %v3035_v5  ;;  %v1303_v10 = vpop.f32.mrb[11].mxu1  ;;  %v2226_v11 = vpop.f32.mrb[11].mxu0 }
 0x170   : > { %2373 = vst.msk [vmem:[%s3915_s10 + $0x38] sm:$0xff] %vm2365_vm3, %v2356_v7  ;;  %v2355_v12 = vsel %vm2323_vm10, %v2307_v63, %v2339_v3  ;;  %v2309_v13 = vadd.f32 %v3906_v17, %v2286_v4  ;;  %v3159_v15 = vadd.f32 %v2226_v11, %v1303_v10 }
 0x171   : > { %2372 = vst.msk [vmem:[%s3915_s10 + $0x30] sm:$0xff] %vm2365_vm3, %v2355_v12  ;;  %vm2326_vm11 = vcmp.gt.f32.partialorder %v2310_v8, 0.0  ;;  %v2342_v16 = vmul.f32 0.1, %v2310_v8  ;;  %v2289_v18 = vmul.f32 %v3158_v9, %v3901_v14 }
 0x172   : > { %vm2325_vm12 = vcmp.gt.f32.partialorder %v2309_v13, 0.0  ;;  %v2341_v19 = vmul.f32 0.1, %v2309_v13  ;;  %v2288_v20 = vmul.f32 %v3159_v15, %v3901_v14  ;;  %v3038_v21 = vpop.f32.mrb[12].mxu1  ;;  %v3142_v22 = vpop.f32.mrb[12].mxu0 }
 0x173   : > { %v2358_v23 = vsel %vm2326_vm11, %v2310_v8, %v2342_v16  ;;  %v2312_v24 = vadd.f32 %v3906_v17, %v2289_v18  ;;  %v3160_v25 = vadd.f32 %v3142_v22, %v3038_v21  ;;  %v1313_v26 = vpop.f32.mrb[13].mxu1  ;;  %v2236_v27 = vpop.f32.mrb[13].mxu0 }
 0x174   : > { %2375 = vst.msk [vmem:[%s3915_s10 + $0x48] sm:$0xff] %vm2365_vm3, %v2358_v23  ;;  %v2357_v28 = vsel %vm2325_vm12, %v2309_v13, %v2341_v19  ;;  %v2311_v29 = vadd.f32 %v3906_v17, %v2288_v20  ;;  %v3161_v30 = vadd.f32 %v2236_v27, %v1313_v26 }
 0x175   : > { %2374 = vst.msk [vmem:[%s3915_s10 + $0x40] sm:$0xff] %vm2365_vm3, %v2357_v28  ;;  %vm2328_vm13 = vcmp.gt.f32.partialorder %v2312_v24, 0.0  ;;  %v2344_v31 = vmul.f32 0.1, %v2312_v24  ;;  %v2291_v32 = vmul.f32 %v3160_v25, %v3901_v14 }
 0x176   : > { %vm2327_vm14 = vcmp.gt.f32.partialorder %v2311_v29, 0.0  ;;  %v2343_v33 = vmul.f32 0.1, %v2311_v29  ;;  %v2290_v34 = vmul.f32 %v3161_v30, %v3901_v14  ;;  %v3041_v35 = vpop.f32.mrb[14].mxu1  ;;  %v3145_v36 = vpop.f32.mrb[14].mxu0 }
 0x177   : > { %v2360_v37 = vsel %vm2328_vm13, %v2312_v24, %v2344_v31  ;;  %v2314_v38 = vadd.f32 %v3906_v17, %v2291_v32  ;;  %v3162_v39 = vadd.f32 %v3145_v36, %v3041_v35  ;;  %v1323_v40 = vpop.f32.mrb[15].mxu1  ;;  %v2246_v41 = vpop.f32.mrb[15].mxu0 }
 0x178   : > { %2377 = vst.msk [vmem:[%s3915_s10 + $0x58] sm:$0xff] %vm2365_vm3, %v2360_v37  ;;  %v2359_v42 = vsel %vm2327_vm14, %v2311_v29, %v2343_v33  ;;  %v2313_v43 = vadd.f32 %v3906_v17, %v2290_v34  ;;  %v3163_v44 = vadd.f32 %v2246_v41, %v1323_v40 }
 0x179   : > { %2376 = vst.msk [vmem:[%s3915_s10 + $0x50] sm:$0xff] %vm2365_vm3, %v2359_v42  ;;  %vm2330_vm15 = vcmp.gt.f32.partialorder %v2314_v38, 0.0  ;;  %v2346_v45 = vmul.f32 0.1, %v2314_v38  ;;  %v2293_v46 = vmul.f32 %v3162_v39, %v3901_v14 }
 0x17a   : > { %vm2329_vm0 = vcmp.gt.f32.partialorder %v2313_v43, 0.0  ;;  %v2345_v47 = vmul.f32 0.1, %v2313_v43  ;;  %v2292_v48 = vmul.f32 %v3163_v44, %v3901_v14 }
 0x17b   : > { %v2362_v49 = vsel %vm2330_vm15, %v2314_v38, %v2346_v45  ;;  %v2316_v50 = vadd.f32 %v3906_v17, %v2293_v46 }
 0x17c   : > { %2379 = vst.msk [vmem:[%s3915_s10 + $0x68] sm:$0xff] %vm2365_vm3, %v2362_v49  ;;  %v2361_v51 = vsel %vm2329_vm0, %v2313_v43, %v2345_v47  ;;  %v2315_v52 = vadd.f32 %v3906_v17, %v2292_v48 }
 0x17d   : > { %2378 = vst.msk [vmem:[%s3915_s10 + $0x60] sm:$0xff] %vm2365_vm3, %v2361_v51  ;;  %vm2332_vm1 = vcmp.gt.f32.partialorder %v2316_v50, 0.0  ;;  %v2348_v53 = vmul.f32 0.1, %v2316_v50 }
 0x17e   : > { %vm2331_vm2 = vcmp.gt.f32.partialorder %v2315_v52, 0.0  ;;  %v2347_v54 = vmul.f32 0.1, %v2315_v52 }
 0x17f   : > { %v2364_v55 = vsel %vm2332_vm1, %v2316_v50, %v2348_v53 }
 0x180   : > { %2381 = vst.msk [vmem:[%s3915_s10 + $0x78] sm:$0xff] %vm2365_vm3, %v2364_v55  ;;  %v2363_v56 = vsel %vm2331_vm2, %v2315_v52, %v2347_v54 }
 0x181   : > { %2380 = vst.msk [vmem:[%s3915_s10 + $0x70] sm:$0xff] %vm2365_vm3, %v2363_v56 }
 0x182 PF: > { %s14_s19 = sadd.s32 1, %s3355_s19   ;;  %s3997_s15 = smov %s3347_s17 }
 0x183   : > { %p11_p7 = scmp.ge.s32.totalorder %s14_s19, 6   ;;  %s3998_s16 = smov %s3351_s18 }
 0x184   : > { %s3999_s17 = smov %s4002_s20  ;;  %s4000_s18 = smov %s4006_s21 }
 0x185   :  { %13 = sbr.rel (!%p11_p7) target bundleno = 3 (0x3), region = 77 }

</bundles_post_ra>
